<compile_context>
chip_gen: v6e
topology: v6e:2x2x1
jax: 0.10.0
libtpu: 0.0.40
codegen_flags: <defaults>
</compile_context>

<pallas_src>
import jax
import jax.numpy as jnp
from jax.experimental import pallas as pl
from jax.experimental.pallas import tpu as pltpu

SELU_ALPHA = 1.6732632423543772
SELU_SCALE = 1.0507009873554805


def _selu(x):
    """Full SELU (used by the f32 reference only)."""
    return SELU_SCALE * jnp.where(x > 0, x, SELU_ALPHA * (jnp.exp(x) - 1.0))


def _selu_unscaled(x):
    """SELU without the outer SCALE multiply (folded into the next layer's weights)."""
    return jnp.where(x > 0, x, SELU_ALPHA * (jnp.exp(x) - 1.0))


def mlp2_kernel(x_ref, bmat_t_ref, bc_ref, flag_ref,
                w1t_ref, b1_ref, w2t_ref, b2_ref, w3t_ref, b3_ref,
                o_ref):
    bc = bc_ref[...]          # (1, N) f32, broadcasts over the batch tile
    flag = flag_ref[...]      # (1, N) f32
    mm_dtype = w1t_ref.dtype  # bf16 (MXU operand dtype) or f32

    # batch_mat_vec(B_sp, x): each batch vector v -> B_sp @ v  ==  x @ B_sp^T
    h = jnp.dot(x_ref[...], bmat_t_ref[...], preferred_element_type=jnp.float32)

    # addcmul(bc_value, h, interior_flag)  -- elementwise stays f32
    h = bc + h * flag

    # fcc: Linear -> SELU -> Linear -> SELU -> Linear
    # (SELU's outer scale is pre-folded into w2t / w3t at prepare time.)
    h = jnp.dot(h.astype(mm_dtype), w1t_ref[...],
                preferred_element_type=jnp.float32) + b1_ref[...]
    h = _selu_unscaled(h)
    h = jnp.dot(h.astype(mm_dtype), w2t_ref[...],
                preferred_element_type=jnp.float32) + b2_ref[...]
    h = _selu_unscaled(h)
    h = jnp.dot(h.astype(mm_dtype), w3t_ref[...],
                preferred_element_type=jnp.float32) + b3_ref[...]

    # final addcmul
    o_ref[...] = bc + h * flag


def prepare_mlp2_params(b_mat, bc_value, interior_flag, params, *, use_bf16=True):
    """One-time (init) preparation: pre-transpose operators, fold SELU scale into
    the downstream weights, and cast MXU operands to bf16."""
    (w1, b1), (w2, b2), (w3, b3) = params
    mm_dtype = jnp.bfloat16 if use_bf16 else jnp.float32
    N = b_mat.shape[0]
    return {
        "bmat_t": b_mat.T.astype(mm_dtype),
        "w1t": w1.T.astype(mm_dtype),
        "w2t": (SELU_SCALE * w2.T).astype(mm_dtype),  # fold scale of SELU #1
        "w3t": (SELU_SCALE * w3.T).astype(mm_dtype),  # fold scale of SELU #2
        "b1": b1.reshape(1, N).astype(jnp.float32),
        "b2": b2.reshape(1, N).astype(jnp.float32),
        "b3": b3.reshape(1, N).astype(jnp.float32),
        "bc": bc_value.reshape(1, N).astype(jnp.float32),
        "flag": interior_flag.reshape(1, N).astype(jnp.float32),
        "mm_dtype": mm_dtype,
    }


def mlp2_forward(x, prep, *, tb=256):
    """x: (B, N) f32. prep: output of prepare_mlp2_params."""
    B, N = x.shape
    mm_dtype = prep["mm_dtype"]

    # Pad batch to a multiple of the batch tile (padded rows are sliced off).
    pad = (-B) % tb
    if pad:
        x = jnp.pad(x, ((0, pad), (0, 0)))
    Bp = B + pad

    x_mm = x.astype(mm_dtype)  # halves activation DMA when bf16

    batch_spec = pl.BlockSpec((tb, N), lambda i: (i, 0))
    resident = lambda shape: pl.BlockSpec(shape, lambda i: (0, 0))  # VMEM-resident

    out = pl.pallas_call(
        mlp2_kernel,
        out_shape=jax.ShapeDtypeStruct((Bp, N), jnp.float32),
        grid=(Bp // tb,),
        in_specs=[
            batch_spec,          # x tile        (tb, N)
            resident((N, N)),    # B_sp^T
            resident((1, N)),    # bc_value
            resident((1, N)),    # interior_flag
            resident((N, N)),    # W1^T
            resident((1, N)),    # b1
            resident((N, N)),    # scale*W2^T
            resident((1, N)),    # b2
            resident((N, N)),    # scale*W3^T
            resident((1, N)),    # b3
        ],
        out_specs=batch_spec,
        compiler_params=pltpu.CompilerParams(
            dimension_semantics=("parallel",),  # shard batch tiles across TCs (v7x)
        ),
    )(x_mm, prep["bmat_t"], prep["bc"], prep["flag"],
      prep["w1t"], prep["b1"], prep["w2t"], prep["b2"], prep["w3t"], prep["b3"])

    return out[:B]


def _reference_f32(x, b_mat, bc_value, interior_flag, params):
    """Pure-f32 reference of the original torch module."""
    (w1, b1), (w2, b2), (w3, b3) = params
    h = x @ b_mat.T
    h = bc_value + h * interior_flag
    h = _selu(h @ w1.T + b1)
    h = _selu(h @ w2.T + b2)
    h = h @ w3.T + b3
    return bc_value + h * interior_flag


def _reference_prepared(x, prep):
    """Reference that mirrors the kernel math exactly (bf16 MXU operands, f32
    accumulation, SELU scale folded) for a tight numerical check."""
    mm = prep["mm_dtype"]
    h = jnp.dot(x.astype(mm), prep["bmat_t"], preferred_element_type=jnp.float32)
    h = prep["bc"] + h * prep["flag"]
    h = jnp.dot(h.astype(mm), prep["w1t"], preferred_element_type=jnp.float32) + prep["b1"]
    h = _selu_unscaled(h)
    h = jnp.dot(h.astype(mm), prep["w2t"], preferred_element_type=jnp.float32) + prep["b2"]
    h = _selu_unscaled(h)
    h = jnp.dot(h.astype(mm), prep["w3t"], preferred_element_type=jnp.float32) + prep["b3"]
    return prep["bc"] + h * prep["flag"]


if __name__ == "__main__":
    key = jax.random.PRNGKey(0)
    B, N = 1024, 128   # batch (MXU M-dim work), args.input_size
    TB = 256           # batch tile per grid step

    keys = jax.random.split(key, 10)
    x = jax.random.normal(keys[0], (B, N), jnp.float32)
    b_mat = jax.random.normal(keys[1], (N, N), jnp.float32) * 0.1  # dense stand-in for B_sp
    bc_value = jax.random.normal(keys[2], (N,), jnp.float32)
    interior_flag = (jax.random.uniform(keys[3], (N,)) > 0.3).astype(jnp.float32)

    def init_linear(kw, kb, n):
        bound = 1.0 / jnp.sqrt(n)
        w = jax.random.uniform(kw, (n, n), jnp.float32, -bound, bound)
        b = jax.random.uniform(kb, (n,), jnp.float32, -bound, bound)
        return w, b

    params = (
        init_linear(keys[4], keys[5], N),
        init_linear(keys[6], keys[7], N),
        init_linear(keys[8], keys[9], N),
    )

    # One-time init-style preparation (transpose / fold / cast).
    prep = prepare_mlp2_params(b_mat, bc_value, interior_flag, params, use_bf16=True)

    out = mlp2_forward(x, prep, tb=TB)
    out = jax.block_until_ready(out)
    assert out.shape == (B, N)

    # Tight check vs. a reference using the exact same prepared (bf16) operands.
    ref_bf16 = _reference_prepared(x, prep)
    assert jnp.allclose(out, ref_bf16, atol=1e-3, rtol=1e-3), "mismatch vs bf16-matched reference"

    # Loose check vs. the pure-f32 torch-semantics reference (bf16 MXU noise only).
    ref_f32 = _reference_f32(x, b_mat, bc_value, interior_flag, params)
    assert jnp.allclose(out, ref_f32, atol=5e-2, rtol=5e-2), "mismatch vs f32 reference"

    print("KERNEL_OK")
</pallas_src>

<mosaic_0001>
module attributes {stable_mosaic.version = 11 : i64} {
  func.func @mlp2_kernel(%arg0: i32, %arg1: memref<256x128xbf16, #tpu.memory_space<vmem>>, %arg2: memref<128x128xbf16, #tpu.memory_space<vmem>>, %arg3: memref<1x128xf32, #tpu.memory_space<vmem>>, %arg4: memref<1x128xf32, #tpu.memory_space<vmem>>, %arg5: memref<128x128xbf16, #tpu.memory_space<vmem>>, %arg6: memref<1x128xf32, #tpu.memory_space<vmem>>, %arg7: memref<128x128xbf16, #tpu.memory_space<vmem>>, %arg8: memref<1x128xf32, #tpu.memory_space<vmem>>, %arg9: memref<128x128xbf16, #tpu.memory_space<vmem>>, %arg10: memref<1x128xf32, #tpu.memory_space<vmem>>, %arg11: memref<256x128xf32, #tpu.memory_space<vmem>>) attributes {dimension_semantics = [#tpu.dimension_semantics<parallel>], iteration_bounds = array<i64: 4>, scalar_prefetch = 0 : i64, scratch_operands = 0 : i64, tpu.core_type = #tpu.core_type<tc>, window_params = [{transform_indices = @transform_0, window_bounds = array<i64: 256, 128>}, {pipeline_mode = #tpu.pipeline_mode<synchronous>, transform_indices = @transform_1, window_bounds = array<i64: 128, 128>}, {pipeline_mode = #tpu.pipeline_mode<synchronous>, transform_indices = @transform_2, window_bounds = array<i64: 1, 128>}, {pipeline_mode = #tpu.pipeline_mode<synchronous>, transform_indices = @transform_3, window_bounds = array<i64: 1, 128>}, {pipeline_mode = #tpu.pipeline_mode<synchronous>, transform_indices = @transform_4, window_bounds = array<i64: 128, 128>}, {pipeline_mode = #tpu.pipeline_mode<synchronous>, transform_indices = @transform_5, window_bounds = array<i64: 1, 128>}, {pipeline_mode = #tpu.pipeline_mode<synchronous>, transform_indices = @transform_6, window_bounds = array<i64: 128, 128>}, {pipeline_mode = #tpu.pipeline_mode<synchronous>, transform_indices = @transform_7, window_bounds = array<i64: 1, 128>}, {pipeline_mode = #tpu.pipeline_mode<synchronous>, transform_indices = @transform_8, window_bounds = array<i64: 128, 128>}, {pipeline_mode = #tpu.pipeline_mode<synchronous>, transform_indices = @transform_9, window_bounds = array<i64: 1, 128>}, {transform_indices = @transform_10, window_bounds = array<i64: 256, 128>}]} {
    %c0 = arith.constant 0 : index
    %c0_0 = arith.constant 0 : index
    %0 = vector.load %arg3[%c0, %c0_0] : memref<1x128xf32, #tpu.memory_space<vmem>>, vector<1x128xf32>
    %c0_1 = arith.constant 0 : index
    %c0_2 = arith.constant 0 : index
    %1 = vector.load %arg4[%c0_1, %c0_2] : memref<1x128xf32, #tpu.memory_space<vmem>>, vector<1x128xf32>
    %c0_3 = arith.constant 0 : index
    %c0_4 = arith.constant 0 : index
    %2 = vector.load %arg1[%c0_3, %c0_4] : memref<256x128xbf16, #tpu.memory_space<vmem>>, vector<256x128xbf16>
    %c0_5 = arith.constant 0 : index
    %c0_6 = arith.constant 0 : index
    %3 = vector.load %arg2[%c0_5, %c0_6] : memref<128x128xbf16, #tpu.memory_space<vmem>>, vector<128x128xbf16>
    %cst = arith.constant dense<0.000000e+00> : vector<256x128xf32>
    %4 = tpu.matmul %2, %3, %cst {dimension_numbers = #tpu.dot_dimension_numbers<[1], [0], [0], [1], [0, 0, 1, 1], [], []>} : vector<256x128xbf16>, vector<128x128xbf16>, vector<256x128xf32> -> vector<256x128xf32>
    %5 = vector.broadcast %1 : vector<1x128xf32> to vector<256x128xf32>
    %6 = arith.mulf %4, %5 : vector<256x128xf32>
    %7 = vector.broadcast %0 : vector<1x128xf32> to vector<256x128xf32>
    %8 = arith.addf %7, %6 : vector<256x128xf32>
    %9 = arith.truncf %8 : vector<256x128xf32> to vector<256x128xbf16>
    %c0_7 = arith.constant 0 : index
    %c0_8 = arith.constant 0 : index
    %10 = vector.load %arg5[%c0_7, %c0_8] : memref<128x128xbf16, #tpu.memory_space<vmem>>, vector<128x128xbf16>
    %cst_9 = arith.constant dense<0.000000e+00> : vector<256x128xf32>
    %11 = tpu.matmul %9, %10, %cst_9 {dimension_numbers = #tpu.dot_dimension_numbers<[1], [0], [0], [1], [0, 0, 1, 1], [], []>} : vector<256x128xbf16>, vector<128x128xbf16>, vector<256x128xf32> -> vector<256x128xf32>
    %c0_10 = arith.constant 0 : index
    %c0_11 = arith.constant 0 : index
    %12 = vector.load %arg6[%c0_10, %c0_11] : memref<1x128xf32, #tpu.memory_space<vmem>>, vector<1x128xf32>
    %13 = vector.broadcast %12 : vector<1x128xf32> to vector<256x128xf32>
    %14 = arith.addf %11, %13 : vector<256x128xf32>
    %cst_12 = arith.constant 0.000000e+00 : f32
    %15 = vector.broadcast %cst_12 : f32 to vector<256x128xf32>
    %16 = arith.cmpf ogt, %14, %15 : vector<256x128xf32>
    %17 = math.exp %14 : vector<256x128xf32>
    %cst_13 = arith.constant 1.000000e+00 : f32
    %18 = vector.broadcast %cst_13 : f32 to vector<256x128xf32>
    %19 = arith.subf %17, %18 : vector<256x128xf32>
    %cst_14 = arith.constant 1.67326319 : f32
    %20 = vector.broadcast %cst_14 : f32 to vector<256x128xf32>
    %21 = arith.mulf %20, %19 : vector<256x128xf32>
    %22 = arith.select %16, %14, %21 : vector<256x128xi1>, vector<256x128xf32>
    %23 = arith.truncf %22 : vector<256x128xf32> to vector<256x128xbf16>
    %c0_15 = arith.constant 0 : index
    %c0_16 = arith.constant 0 : index
    %24 = vector.load %arg7[%c0_15, %c0_16] : memref<128x128xbf16, #tpu.memory_space<vmem>>, vector<128x128xbf16>
    %cst_17 = arith.constant dense<0.000000e+00> : vector<256x128xf32>
    %25 = tpu.matmul %23, %24, %cst_17 {dimension_numbers = #tpu.dot_dimension_numbers<[1], [0], [0], [1], [0, 0, 1, 1], [], []>} : vector<256x128xbf16>, vector<128x128xbf16>, vector<256x128xf32> -> vector<256x128xf32>
    %c0_18 = arith.constant 0 : index
    %c0_19 = arith.constant 0 : index
    %26 = vector.load %arg8[%c0_18, %c0_19] : memref<1x128xf32, #tpu.memory_space<vmem>>, vector<1x128xf32>
    %27 = vector.broadcast %26 : vector<1x128xf32> to vector<256x128xf32>
    %28 = arith.addf %25, %27 : vector<256x128xf32>
    %cst_20 = arith.constant 0.000000e+00 : f32
    %29 = vector.broadcast %cst_20 : f32 to vector<256x128xf32>
    %30 = arith.cmpf ogt, %28, %29 : vector<256x128xf32>
    %31 = math.exp %28 : vector<256x128xf32>
    %cst_21 = arith.constant 1.000000e+00 : f32
    %32 = vector.broadcast %cst_21 : f32 to vector<256x128xf32>
    %33 = arith.subf %31, %32 : vector<256x128xf32>
    %cst_22 = arith.constant 1.67326319 : f32
    %34 = vector.broadcast %cst_22 : f32 to vector<256x128xf32>
    %35 = arith.mulf %34, %33 : vector<256x128xf32>
    %36 = arith.select %30, %28, %35 : vector<256x128xi1>, vector<256x128xf32>
    %37 = arith.truncf %36 : vector<256x128xf32> to vector<256x128xbf16>
    %c0_23 = arith.constant 0 : index
    %c0_24 = arith.constant 0 : index
    %38 = vector.load %arg9[%c0_23, %c0_24] : memref<128x128xbf16, #tpu.memory_space<vmem>>, vector<128x128xbf16>
    %cst_25 = arith.constant dense<0.000000e+00> : vector<256x128xf32>
    %39 = tpu.matmul %37, %38, %cst_25 {dimension_numbers = #tpu.dot_dimension_numbers<[1], [0], [0], [1], [0, 0, 1, 1], [], []>} : vector<256x128xbf16>, vector<128x128xbf16>, vector<256x128xf32> -> vector<256x128xf32>
    %c0_26 = arith.constant 0 : index
    %c0_27 = arith.constant 0 : index
    %40 = vector.load %arg10[%c0_26, %c0_27] : memref<1x128xf32, #tpu.memory_space<vmem>>, vector<1x128xf32>
    %41 = vector.broadcast %40 : vector<1x128xf32> to vector<256x128xf32>
    %42 = arith.addf %39, %41 : vector<256x128xf32>
    %43 = vector.broadcast %1 : vector<1x128xf32> to vector<256x128xf32>
    %44 = arith.mulf %42, %43 : vector<256x128xf32>
    %45 = vector.broadcast %0 : vector<1x128xf32> to vector<256x128xf32>
    %46 = arith.addf %45, %44 : vector<256x128xf32>
    %c0_28 = arith.constant 0 : index
    %c0_29 = arith.constant 0 : index
    %47 = vector.load %arg11[%c0_28, %c0_29] : memref<256x128xf32, #tpu.memory_space<vmem>>, vector<256x128xf32>
    tpu.vector_store %arg11[%c0_28, %c0_29], %46 {strides = array<i32>} : memref<256x128xf32, #tpu.memory_space<vmem>>, vector<256x128xf32>,
    return
  }
  func.func @transform_0(%arg0: i32) -> (i32, i32) {
    %c0_i32 = arith.constant 0 : i32
    %c0_i32_0 = arith.constant 0 : i32
    return %arg0, %c0_i32 : i32, i32
  }
  func.func @transform_1(%arg0: i32) -> (i32, i32) {
    %c0_i32 = arith.constant 0 : i32
    %c0_i32_0 = arith.constant 0 : i32
    %c0_i32_1 = arith.constant 0 : i32
    return %c0_i32, %c0_i32_0 : i32, i32
  }
  func.func @transform_2(%arg0: i32) -> (i32, i32) {
    %c0_i32 = arith.constant 0 : i32
    %c0_i32_0 = arith.constant 0 : i32
    %c0_i32_1 = arith.constant 0 : i32
    return %c0_i32, %c0_i32_0 : i32, i32
  }
  func.func @transform_3(%arg0: i32) -> (i32, i32) {
    %c0_i32 = arith.constant 0 : i32
    %c0_i32_0 = arith.constant 0 : i32
    %c0_i32_1 = arith.constant 0 : i32
    return %c0_i32, %c0_i32_0 : i32, i32
  }
  func.func @transform_4(%arg0: i32) -> (i32, i32) {
    %c0_i32 = arith.constant 0 : i32
    %c0_i32_0 = arith.constant 0 : i32
    %c0_i32_1 = arith.constant 0 : i32
    return %c0_i32, %c0_i32_0 : i32, i32
  }
  func.func @transform_5(%arg0: i32) -> (i32, i32) {
    %c0_i32 = arith.constant 0 : i32
    %c0_i32_0 = arith.constant 0 : i32
    %c0_i32_1 = arith.constant 0 : i32
    return %c0_i32, %c0_i32_0 : i32, i32
  }
  func.func @transform_6(%arg0: i32) -> (i32, i32) {
    %c0_i32 = arith.constant 0 : i32
    %c0_i32_0 = arith.constant 0 : i32
    %c0_i32_1 = arith.constant 0 : i32
    return %c0_i32, %c0_i32_0 : i32, i32
  }
  func.func @transform_7(%arg0: i32) -> (i32, i32) {
    %c0_i32 = arith.constant 0 : i32
    %c0_i32_0 = arith.constant 0 : i32
    %c0_i32_1 = arith.constant 0 : i32
    return %c0_i32, %c0_i32_0 : i32, i32
  }
  func.func @transform_8(%arg0: i32) -> (i32, i32) {
    %c0_i32 = arith.constant 0 : i32
    %c0_i32_0 = arith.constant 0 : i32
    %c0_i32_1 = arith.constant 0 : i32
    return %c0_i32, %c0_i32_0 : i32, i32
  }
  func.func @transform_9(%arg0: i32) -> (i32, i32) {
    %c0_i32 = arith.constant 0 : i32
    %c0_i32_0 = arith.constant 0 : i32
    %c0_i32_1 = arith.constant 0 : i32
    return %c0_i32, %c0_i32_0 : i32, i32
  }
  func.func @transform_10(%arg0: i32) -> (i32, i32) {
    %c0_i32 = arith.constant 0 : i32
    %c0_i32_0 = arith.constant 0 : i32
    return %arg0, %c0_i32 : i32, i32
  }
}

</mosaic_0001>

<bundles_post_ra>
// kernel: tpu_custom_call.1
= control target key start
LH: loop header
LB: loop body
LE: loop exit
PB: predicated region body
PF: predicated region fallthrough
CT: control target
= control target key end

     0   :  { %s4062_s0 = inlined_call_operand.hbm [shape: bf16[1024,128], index: 0, kind: input, shape index: {}]   ;;  %s4063_s1 = inlined_call_operand.hbm [shape: bf16[128,128], index: 1, kind: input, shape index: {}]   ;;  %s4064_s2 = inlined_call_operand.vmem [shape: f32[1,128], index: 2, kind: input, shape index: {}]   ;;  %s4065_s3 = inlined_call_operand.vmem [shape: f32[1,128], index: 3, kind: input, shape index: {}]   ;;  %s4066_s4 = inlined_call_operand.hbm [shape: bf16[128,128], index: 4, kind: input, shape index: {}]   ;;  %s4067_s5 = inlined_call_operand.vmem [shape: f32[1,128], index: 5, kind: input, shape index: {}]   ;;  %s4068_s6 = inlined_call_operand.hbm [shape: bf16[128,128], index: 6, kind: input, shape index: {}]   ;;  %s4069_s7 = inlined_call_operand.vmem [shape: f32[1,128], index: 7, kind: input, shape index: {}]   ;;  %s4070_s8 = inlined_call_operand.hbm [shape: bf16[128,128], index: 8, kind: input, shape index: {}]   ;;  %s4071_s9 = inlined_call_operand.vmem [shape: f32[1,128], index: 9, kind: input, shape index: {}]   ;;  %s4072_s10 = inlined_call_operand.hbm [shape: f32[1024,128], index: 10, kind: output, shape index: {}]  }
   0x1   :  { %4079 = sst [smem:[#allocation16_spill]] %s4063_s1 }
   0x2   :  { %4080 = sst [smem:[#allocation17_spill]] %s4066_s4 }
   0x3   :  { %4081 = sst [smem:[#allocation18_spill]] %s4068_s6 }
   0x4   :  { %4082 = sst [smem:[#allocation19_spill]] %s4070_s8 }
   0x5   :  { %15 = vsyncpa [#allocation3], 0 }
   0x6   :  { %17 = vsyncpa [#allocation3 + $0x1], 0 }
   0x7   :  { %18 = vsyncpa [#allocation6], 0 }
   0x8   :  { %19 = vsyncpa [#allocation9], 0 }
   0x9   :  { %20 = vsyncpa [#allocation4], 0 }
   0xa   :  { %22 = vsyncpa [#allocation4 + $0x1], 0  ;;  %s3188_s13 = smov 0   ;;  %s3190_s14 = smov 0  }
   0xb   :  { %s3192_s15 = smov 0   ;;  %s3194_s16 = smov 0  }
   0xc LB: > { %s3209_s17 = sadd.s32 4294967295, %s3121_s16   ;;  %s2219_s18 = sadd.s32 4294967294, %s3121_s16   ;;  %s3121_s16 = sphi %s3194_s16, %s4106_s16   ;;  %s3117_s15 = sphi %s3192_s15, %s4105_s15   ;;  %s3113_s14 = sphi %s3190_s14, %s4104_s14   ;;  %s3109_s13 = sphi %s3188_s13, %s4103_s13  }
   0xd   : > { %p48_p0 = scmp.ne.s32.totalorder %s3113_s14, %s3109_s13  ;;  %p4073_p1 = scmp.eq.s32.totalorder %s3209_s17, 0 }
   0xe   : > { %p261_p2 = scmp.eq.s32.totalorder %s3209_s17, 3  ;;  %p267_p3 = scmp.eq.s32.totalorder %s2219_s18, 3 }
   0xf   : > { %p3218_p4 = por %p4073_p1, %p48_p0  ;;  %p2220_p5 = scmp.ge.s32.totalorder %s3121_s16, 1 }
  0x10   : > { %p3223_p6 = por %p267_p3, %p48_p0  ;;  %p274_p7 = scmp.lt.s32.totalorder %s3121_s16, 5 }
  0x11   : > { %s4083_s19 = scalar_select %p3218_p4, 1, 0 }
  0x12   : > { %s4084_s20 = scalar_select %p3223_p6, 1, 0 }
  0x13   : > { %p3228_p8 = pnand %p2220_p5, %p274_p7  ;;  %s3123_s22 = smov [#allocation5]  }
  0x14   : > { %s286_s23 = sshll.u32 %s3123_s22, 4  ;;  %s3124_s25 = smov [#allocation8]   ;;  %s287_s23 = int_to_ptr.vmem [resolvable:$true] %s286_s23 }
  0x15   : > { %s4085_s21 = scalar_select %p3228_p8, 1, 0 }
  0x16   : > { %p2668_p9 = pneg %p3228_p8  ;;  %s321_s26 = sshll.u32 %s3124_s25, 4  ;;  %s322_s26 = int_to_ptr.vmem [resolvable:$true] %s321_s26 }
  0x17   : > { %s3125_s27 = smov [#allocation7]   ;;  %s2928_s29 = scalar_lea.vmem %s287_s23, 1024 }
  0x18   : > { %p3236_p10 = pnand %p2668_p9, %p4073_p1  ;;  %s305_s28 = sshll.u32 %s3125_s27, 4  ;;  %s306_s28 = int_to_ptr.vmem [resolvable:$true] %s305_s28 }
  0x19   : > { %p2929_p12 = scmp.ne.s32.totalorder %s287_s23, %s2928_s29  ;;  %p2936_p3 = scmp.lt.s32.totalorder %s287_s23, %s287_s23 }
  0x1a   : > { %p2919_p11 = pneg %p3236_p10  ;;  %p2937_p5 = scmp.lt.s32.totalorder %s2928_s29, %s2928_s29 }
  0x1c   : > { %p2931_p13 = pnand %p2929_p12, %p2919_p11  ;;  %p2938_p7 = por %p2937_p5, %p2936_p3 }
  0x1e   : > { %p2932_p0 = pneg %p2931_p13 }
  0x20   : > { %p2939_p9 = pnand %p2938_p7, %p2932_p0 }
  0x22   : > { %2942 = shalt.err (!%p2939_p9)
}
  0x23   : > { %s4074_s30 = smov 64   ;;  %s4075_s11 = smov 4  }
  0x24   : > { %s4087_s1 = sld [smem:[#allocation16_spill]]  ;;  %s2954_s22 = scalar_lea.vmem %s322_s26, 1024 }
  0x25   : > { %p2955_p12 = scmp.ne.s32.totalorder %s322_s26, %s2954_s22  ;;  %p2962_p0 = scmp.lt.s32.totalorder %s322_s26, %s322_s26 }
  0x26   : > { %p2963_p5 = scmp.lt.s32.totalorder %s2954_s22, %s2954_s22 }
  0x27   : > { %p2957_p13 = pnand %p2955_p12, %p2919_p11 }
  0x28   : > { %p2964_p7 = por %p2963_p5, %p2962_p0 }
  0x29   : > { %p2958_p3 = pneg %p2957_p13 }
  0x2a   : > { %2671 = dma.hbm_to_vmem [thread:$0]  (!%p3236_p10), %s4087_s1, 1024, %s287_s23, [#allocation6], %s4074_s30, %s4074_s30, %s4075_s11  }
  0x2b   : > { %p2965_p9 = pnand %p2964_p7, %p2958_p3 }
  0x2d   : > { %2968 = shalt.err (!%p2965_p9)
}
  0x2e   : > { %s4088_s6 = sld [smem:[#allocation18_spill]]  ;;  %s2980_s23 = scalar_lea.vmem %s306_s28, 1024 }
  0x2f   : > { %p2981_p1 = scmp.ne.s32.totalorder %s306_s28, %s2980_s23  ;;  %p2988_p0 = scmp.lt.s32.totalorder %s306_s28, %s306_s28 }
  0x30   : > { %p2989_p3 = scmp.lt.s32.totalorder %s2980_s23, %s2980_s23 }
  0x31   : > { %p2983_p12 = pnand %p2981_p1, %p2919_p11 }
  0x32   : > { %p2990_p5 = por %p2989_p3, %p2988_p0 }
  0x33   : > { %p2984_p13 = pneg %p2983_p12 }
  0x34   : > { %2677 = dma.hbm_to_vmem [thread:$0]  (!%p3236_p10), %s4088_s6, 1024, %s322_s26, [#allocation9], %s4074_s30, %s4074_s30, %s4075_s11  }
  0x35   : > { %p2991_p7 = pnand %p2990_p5, %p2984_p13 }
  0x37   : > { %2994 = shalt.err (!%p2991_p7)
}
  0x38   : > { %s4089_s4 = sld [smem:[#allocation17_spill]]  ;;  %s3128_s26 = smov [#allocation10]  }
  0x39   : > { %s337_s18 = sshll.u32 %s3128_s26, 4  ;;  %s338_s18 = int_to_ptr.vmem [resolvable:$true] %s337_s18 }
  0x3a   : > { %s3006_s22 = scalar_lea.vmem %s338_s18, 1024  ;;  %p3014_p13 = scmp.lt.s32.totalorder %s338_s18, %s338_s18 }
  0x3b   : > { %p3007_p1 = scmp.ne.s32.totalorder %s338_s18, %s3006_s22  ;;  %p3015_p0 = scmp.lt.s32.totalorder %s3006_s22, %s3006_s22 }
  0x3d   : > { %p3009_p9 = pnand %p3007_p1, %p2919_p11  ;;  %p3016_p3 = por %p3015_p0, %p3014_p13 }
  0x3e   : > { %2674 = dma.hbm_to_vmem [thread:$0]  (!%p3236_p10), %s4089_s4, 1024, %s306_s28, [#allocation6], %s4074_s30, %s4074_s30, %s4075_s11  }
  0x3f   : > { %p3010_p12 = pneg %p3009_p9 }
  0x41   : > { %p3017_p5 = pnand %p3016_p3, %p3010_p12 }
  0x43   : > { %3020 = shalt.err (!%p3017_p5)
}
  0x44   : > { %s4090_s8 = sld [smem:[#allocation19_spill]]  ;;  %s3287_s27 = sadd.s32 1, %s3121_s16  }
  0x45   : > { %s35_s24 = sadd.s32 1, %s3117_s15  ;;  %s32_s23 = ssub.s32 %s3121_s16, %s3287_s27 }
  0x46   : > { %p42_p11 = scmp.ne.s32.totalorder %s3117_s15, %s3113_s14  ;;  %p33_p7 = scmp.eq.s32.totalorder %s32_s23, 0 }
  0x47   : > { %p43_p1 = scmp.eq.s32.totalorder %s3121_s16, 0  ;;  %p2693_p12 = scmp.lt.s32.totalorder %s3121_s16, 4 }
  0x48   : > { %p3297_p9 = por %p261_p2, %p42_p11  ;;  %s354_s26 = sand.u32 1, %s3117_s15  }
  0x49   : > { %s3303_s12 = scalar_select %p33_p7, %s3117_s15, %s35_s24  }
  0x4a   : > { %2680 = dma.hbm_to_vmem [thread:$0]  (!%p3236_p10), %s4090_s8, 1024, %s338_s18, [#allocation9], %s4074_s30, %s4074_s30, %s4075_s11  }
  0x4b   : > { %s4091_s29 = scalar_select %p3297_p9, 1, 0 }
  0x4c   : > { %p44_p13 = por %p43_p1, %p42_p11  ;;  %s2226_s22 = sshll.u32 %s354_s26, 7 }
  0x4d   : > { %s2358_s18 = sshll.u32 %s3121_s16, 11  ;;  %s358_s23 = scalar_lea.vmem [#allocation2], %s2226_s22 }
  0x4e   : > { %s3310_s30 = scalar_lea.hbm %s4062_s0, %s2358_s18  ;;  %s365_s11 = sshll.u32 %s358_s23, 4  ;;  %s3312_s11 = int_to_ptr.vmem [resolvable:$true] %s365_s11 }
  0x4f   : > { %p3314_p2 = pnand %p2693_p12, %p44_p13  ;;  %s3318_s24 = scalar_lea.sflag [#allocation3], %s354_s26 }
  0x50   : > { %s3021_s4 = scalar_lea.hbm %s3310_s30, 2048  ;;  %s3026_s22 = scalar_lea.hbm %s4062_s0, 8192 }
  0x51   : > { %p3022_p10 = scmp.ne.s32.totalorder %s3310_s30, %s3021_s4  ;;  %p3023_p0 = pneg %p3314_p2 }
  0x52   : > { %p3027_p11 = scmp.lt.s32.totalorder %s3310_s30, %s4062_s0  ;;  %p3028_p7 = scmp.lt.s32.totalorder %s3026_s22, %s3021_s4 }
  0x53   : > { %p3024_p3 = pnand %p3023_p0, %p3022_p10 }
  0x54   : > { %p3029_p1 = por %p3028_p7, %p3027_p11 }
  0x55   : > { %p3025_p5 = pneg %p3024_p3 }
  0x57   : > { %p3030_p12 = pnand %p3029_p1, %p3025_p5 }
  0x59   : > { %3033 = shalt.err (!%p3030_p12)
}
  0x5a   : > { %s3034_s26 = scalar_lea.vmem %s3312_s11, 2048  ;;  %s3129_s6 = smov [#allocation2]  }
  0x5b   : > { %p3035_p13 = scmp.ne.s32.totalorder %s3312_s11, %s3034_s26  ;;  %s3039_s8 = sshll.u32 %s3129_s6, 4  ;;  %s3040_s8 = int_to_ptr.vmem [resolvable:$false] %s3039_s8 }
  0x5c   : > { %s3041_s18 = scalar_lea.vmem %s3040_s8, 4096  ;;  %p3042_p3 = scmp.lt.s32.totalorder %s3312_s11, %s3040_s8 }
  0x5d   : > { %p3037_p6 = pnand %p3035_p13, %p3023_p0  ;;  %p3043_p9 = scmp.lt.s32.totalorder %s3041_s18, %s3034_s26 }
  0x5f   : > { %p3038_p10 = pneg %p3037_p6  ;;  %p3044_p4 = por %p3043_p9, %p3042_p3 }
  0x61   : > { %p3045_p8 = pnand %p3044_p4, %p3038_p10 }
  0x63   : > { %3048 = shalt.err (!%p3045_p8)
}
  0x64   : > { %s4093_s4 = smov 4   ;;  %s4094_s28 = smov 64  }
  0x65   : > { %2684 = dma.hbm_to_vmem [thread:$0]  (!%p3314_p2), %s3310_s30, 2048, %s3312_s11, %s3318_s24, %s4094_s28, %s4094_s28, %s4093_s4  }
  0x66   : > { %p4095_p6 = scmp.ne.s32.totalorder %s4085_s21, 0 }
  0x67   : > { %s3345_s6 = sand.u32 (!%p4095_p6), 1, %s3113_s14   ;;  %p4096_p4 = scmp.ne.s32.totalorder (!%p4095_p6), %s4083_s19, 0 }
  0x68   : > { %377 = sbr.rel (%p4095_p6) target bundleno = 1082 (0x43a), region = 60  ;;  %s2230_s8 = sshll.u32 (!%p4095_p6), %s3345_s6, 7 }
  0x69   : > { %s380_s22 = scalar_lea.sflag (!%p4095_p6), [#allocation3], %s3345_s6  ;;  %s3349_s25 = scalar_lea.vmem (!%p4095_p6), [#allocation2], %s2230_s8 }
  0x6d   : > { %3092 = dma.done.wait (%p4096_p4), %s380_s22, 2048  }
  0x6e   : > { %3094 = vsyncadd (%p4096_p4), %s380_s22, 4294965248  ;;  %p4097_p8 = scmp.eq.s32.totalorder %s3209_s17, 0 }
  0x70   : > { %3096 = dma.done.wait (%p4097_p8), [#allocation6], 2048   ;;  %p4098_p9 = pmov %p4097_p8 }
  0x71   : > { %p4099_p2 = pmov %p4097_p8 }
  0x72   : > { %3098 = vsyncadd (%p4098_p9), [#allocation6], 4294965248 }
  0x73   : > { %3100 = dma.done.wait (%p4099_p2), [#allocation9], 2048   ;;  %p4100_p0 = pmov %p4099_p2 }
  0x74   : > { %v2739_v0 = vld [vmem:[#allocation5 + $0x38] sm:$0xff]   ;;  %v2740_v1 = vld [vmem:[#allocation5 + $0x30] sm:$0xff]   ;;  %v2741_v2 = vld [vmem:[#allocation5 + $0x28] sm:$0xff]   ;;  %s2235_s28 = sshll.u32 %s3345_s6, 8  ;;  %s2359_s21 = sshll.u32 %s3209_s17, 12 }
  0x75   : > { %3102 = vsyncadd (%p4100_p0), [#allocation9], 4294965248  ;;  %2456 = vmatprep.subr.bf16.mxu0 %v2739_v0  ;;  %v2742_v3 = vld [vmem:[#allocation5 + $0x20] sm:$0xff]   ;;  %v2743_v5 = vld [vmem:[#allocation5 + $0x18] sm:$0xff]   ;;  %s3889_s19 = scalar_lea.vmem [#allocation11], %s2235_s28  ;;  %s4015_s23 = scalar_lea.hbm %s4072_s10, %s2359_s21 }
  0x76   : > { %2457 = vmatpush3.bf16.msra.mxu0 %v2739_v0  ;;  %v2747_v4 = vld [vmem:[%s3349_s25] sm:$0xff]   ;;  %v2744_v6 = vld [vmem:[#allocation5 + $0x10] sm:$0xff]   ;;  %v2745_v7 = vld [vmem:[#allocation5 + $0x8] sm:$0xff]   ;;  %s2108_s30 = sshll.u32 %s3889_s19, 4  ;;  %s2095_s17 = scalar_lea.sflag [#allocation4], %s3345_s6  ;;  %s4017_s30 = int_to_ptr.vmem [resolvable:$true] %s2108_s30 }
  0x77   : > { %2458 = vmatprep.subr.bf16.mxu0 %v2740_v1  ;;  %2472 = vmatprep.mubr.bf16.mxu0 %v2747_v4  ;;  %v2746_v8 = vld [vmem:[#allocation5] sm:$0xff]   ;;  %v2763_v9 = vld [vmem:[#allocation7 + $0x38] sm:$0xff]   ;;  %v2764_v10 = vld [vmem:[#allocation7 + $0x30] sm:$0xff]   ;;  %s3049_s26 = scalar_lea.vmem %s4017_s30, 4096  ;;  %p4101_p11 = scmp.ne.s32.totalorder %s4091_s29, 0 }
  0x78   : > { %2504 = vmatprep.subr.bf16.mxu1 %v2763_v9  ;;  %v2765_v11 = vld [vmem:[#allocation7 + $0x28] sm:$0xff]   ;;  %v2749_v13 = vld [vmem:[%s3349_s25 + $0x10] sm:$0xff]   ;;  %v2766_v14 = vld [vmem:[#allocation7 + $0x20] sm:$0xff]   ;;  %p3050_p5 = scmp.ne.s32.totalorder %s4017_s30, %s3049_s26  ;;  %s3130_s18 = smov [#allocation11]  }
  0x79   : > { %2505 = vmatpush3.bf16.msra.mxu1 %v2763_v9  ;;  %v2748_v12 = vld [vmem:[%s3349_s25 + $0x8] sm:$0xff]   ;;  %v2767_v15 = vld [vmem:[#allocation7 + $0x18] sm:$0xff]   ;;  %v2751_v17 = vld [vmem:[%s3349_s25 + $0x20] sm:$0xff]   ;;  %s3053_s4 = sshll.u32 %s3130_s18, 4  ;;  %s3054_s4 = int_to_ptr.vmem [resolvable:$false] %s3053_s4 }
  0x7a   : > { %2459 = vmatpush3.bf16.msra.mxu0 %v2740_v1  ;;  %2506 = vmatprep.subr.bf16.mxu1 %v2764_v10  ;;  %v2750_v16 = vld [vmem:[%s3349_s25 + $0x18] sm:$0xff]   ;;  %v2752_v18 = vld [vmem:[%s3349_s25 + $0x28] sm:$0xff]   ;;  %v2753_v19 = vld [vmem:[%s3349_s25 + $0x30] sm:$0xff]   ;;  %p3051_p7 = pnand %p3050_p5, %p4101_p11  ;;  %s3055_s28 = scalar_lea.vmem %s3054_s4, 8192 }
  0x7b   : > { %2460 = vmatprep.subr.bf16.mxu0 %v2741_v2  ;;  %v2754_v20 = vld [vmem:[%s3349_s25 + $0x38] sm:$0xff]   ;;  %v2755_v21 = vld [vmem:[%s3349_s25 + $0x40] sm:$0xff]   ;;  %v2756_v22 = vld [vmem:[%s3349_s25 + $0x48] sm:$0xff]   ;;  %p3056_p12 = scmp.lt.s32.totalorder %s4017_s30, %s3054_s4  ;;  %p3057_p13 = scmp.lt.s32.totalorder %s3055_s28, %s3049_s26 }
  0x7c   : > { %v2757_v23 = vld [vmem:[%s3349_s25 + $0x50] sm:$0xff]   ;;  %v2758_v24 = vld [vmem:[%s3349_s25 + $0x58] sm:$0xff]   ;;  %v2759_v25 = vld [vmem:[%s3349_s25 + $0x60] sm:$0xff]   ;;  %p3052_p1 = pneg %p3051_p7 }
  0x7d   : > { %2507 = vmatpush3.bf16.msra.mxu1 %v2764_v10  ;;  %v2760_v26 = vld [vmem:[%s3349_s25 + $0x68] sm:$0xff]   ;;  %v2761_v27 = vld [vmem:[%s3349_s25 + $0x70] sm:$0xff]   ;;  %v2762_v28 = vld [vmem:[%s3349_s25 + $0x78] sm:$0xff]   ;;  %p3058_p10 = por %p3057_p13, %p3056_p12 }
  0x7e   : > { %2461 = vmatpush3.bf16.msra.mxu0 %v2741_v2  ;;  %2508 = vmatprep.subr.bf16.mxu1 %v2765_v11  ;;  %v2768_v29 = vld [vmem:[#allocation7 + $0x10] sm:$0xff]   ;;  %v2769_v30 = vld [vmem:[#allocation7 + $0x8] sm:$0xff]   ;;  %v2770_v31 = vld [vmem:[#allocation7] sm:$0xff]  }
  0x7f   : > { %2462 = vmatprep.subr.bf16.mxu0 %v2742_v3  ;;  %v2771_v32 = vld [vmem:[#allocation8 + $0x38] sm:$0xff]   ;;  %v2772_v33 = vld [vmem:[#allocation8 + $0x30] sm:$0xff]   ;;  %v2773_v34 = vld [vmem:[#allocation8 + $0x28] sm:$0xff]   ;;  %p3059_p3 = pnand %p3058_p10, %p3052_p1 }
  0x80   : > { %v2774_v35 = vld [vmem:[#allocation8 + $0x20] sm:$0xff]  }
  0x81   : > { %2509 = vmatpush3.bf16.msra.mxu1 %v2765_v11  ;;  %v3382_v38 = vld [vmem:[%s4065_s3] ss:$0 sm:$0xff] }
  0x82   : > { %2463 = vmatpush3.bf16.msra.mxu0 %v2742_v3  ;;  %2510 = vmatprep.subr.bf16.mxu1 %v2766_v14  ;;  %v3390_v44 = vld [vmem:[%s4064_s2] ss:$0 sm:$0xff] }
  0x83   : > { %2464 = vmatprep.subr.bf16.mxu0 %v2743_v5 }
  0x85   : > { %2511 = vmatpush3.bf16.msra.mxu1 %v2766_v14 }
  0x86   : > { %2465 = vmatpush3.bf16.msra.mxu0 %v2743_v5  ;;  %2512 = vmatprep.subr.bf16.mxu1 %v2767_v15 }
  0x87   : > { %2466 = vmatprep.subr.bf16.mxu0 %v2744_v6 }
  0x89   : > { %2513 = vmatpush3.bf16.msra.mxu1 %v2767_v15 }
  0x8a   : > { %2467 = vmatpush3.bf16.msra.mxu0 %v2744_v6  ;;  %2514 = vmatprep.subr.bf16.mxu1 %v2768_v29 }
  0x8b   : > { %2468 = vmatprep.subr.bf16.mxu0 %v2745_v7 }
  0x8d   : > { %2515 = vmatpush3.bf16.msra.mxu1 %v2768_v29 }
  0x8e   : > { %2469 = vmatpush3.bf16.msra.mxu0 %v2745_v7  ;;  %2516 = vmatprep.subr.bf16.mxu1 %v2769_v30 }
  0x8f   : > { %2470 = vmatprep.subr.bf16.mxu0 %v2746_v8 }
  0x91   : > { %2517 = vmatpush3.bf16.msra.mxu1 %v2769_v30 }
  0x92   : > { %2471 = vmatpush3.bf16.msra.mxu0 %v2746_v8  ;;  %2518 = vmatprep.subr.bf16.mxu1 %v2770_v31 }
  0x93   : > { %2552 = vmatprep.subr.bf16.mxu0 %v2771_v32 }
  0x95   : > { %2473 = vmatmul.mubr.bf16.vlgmr.msra.gmra.mxu0 %v2748_v12  ;;  %2519 = vmatpush3.bf16.msra.mxu1 %v2770_v31 }
  0x96   : > { %2476 = vmatprep.mubr.bf16.mxu0 %v2749_v13  ;;  %2553 = vmatpush3.bf16.msra.mxu0 %v2771_v32 }
  0x97   : > { %2554 = vmatprep.subr.bf16.mxu0 %v2772_v33 }
  0x9a   : > { %2555 = vmatpush3.bf16.msra.mxu0 %v2772_v33 }
  0x9b   : > { %2556 = vmatprep.subr.bf16.mxu0 %v2773_v34 }
  0x9d   : > { %2477 = vmatmul.mubr.bf16.gmra.mxu0 %v2750_v16 }
  0x9e   : > { %2480 = vmatprep.mubr.bf16.mxu0 %v2751_v17  ;;  %2557 = vmatpush3.bf16.msra.mxu0 %v2773_v34 }
  0x9f   : > { %2558 = vmatprep.subr.bf16.mxu0 %v2774_v35 }
  0xa2   : > { %2559 = vmatpush3.bf16.msra.mxu0 %v2774_v35 }
  0xa5   : > { %2481 = vmatmul.mubr.bf16.gmra.mxu0 %v2752_v18 }
  0xa6   : > { %2484 = vmatprep.mubr.bf16.mxu0 %v2753_v19 }
  0xad   : > { %2485 = vmatmul.mubr.bf16.gmra.mxu0 %v2754_v20 }
  0xae   : > { %2488 = vmatprep.mubr.bf16.mxu0 %v2755_v21 }
  0xb5   : > { %2489 = vmatmul.mubr.bf16.gmra.mxu0 %v2756_v22 }
  0xb6   : > { %2492 = vmatprep.mubr.bf16.mxu0 %v2757_v23 }
  0xbd   : > { %2493 = vmatmul.mubr.bf16.gmra.mxu0 %v2758_v24 }
  0xbe   : > { %2496 = vmatprep.mubr.bf16.mxu0 %v2759_v25 }
  0xc5   : > { %2497 = vmatmul.mubr.bf16.gmra.mxu0 %v2760_v26 }
  0xc6   : > { %2500 = vmatprep.mubr.bf16.mxu0 %v2761_v27 }
  0xcd   : > { %2501 = vmatmul.mubr.bf16.gmra.mxu0 %v2762_v28 }
 0x155   : > { %v2474_v36 = vpop.f32.mrf.mxu0 }
 0x156   : > { %v802_v42 = vmul.f32 %v2474_v36, %v3382_v38 }
 0x157   : > { %v667_v37 = vpop.f32.mrf.mxu0 }
 0x158   : > { %v800_v40 = vmul.f32 %v3382_v38, %v667_v37  ;;  %v840_v50 = vadd.f32 %v3390_v44, %v802_v42 }
 0x159   : > { %v2475_v39 = vpop.f32.mrf.mxu0 }
 0x15a   : > { %v803_v41 = vmul.f32 %v2475_v39, %v3382_v38  ;;  %v838_v48 = vadd.f32 %v3390_v44, %v800_v40 }
 0x15b   : > { %v670_v43 = vpop.f32.mrf.mxu0 }
 0x15c   : > { %v801_v45 = vmul.f32 %v3382_v38, %v670_v43  ;;  %v841_v46 = vadd.f32 %v3390_v44, %v803_v41 }
 0x15d   : > { %v2478_v47 = vpop.f32.mrf.mxu0 }
 0x15e   : > { %v839_v49 = vadd.f32 %v3390_v44, %v801_v45  ;;  %v871_v54 = vpack.c.bf16 %v841_v46, %v840_v50  ;;  %v806_v57 = vmul.f32 %v2478_v47, %v3382_v38 }
 0x15f   : > { %v683_v51 = vpop.f32.mrf.mxu0 }
 0x160   : > { %v870_v52 = vpack.c.bf16 %v839_v49, %v838_v48  ;;  %v804_v55 = vmul.f32 %v3382_v38, %v683_v51  ;;  %v844_v0 = vadd.f32 %v3390_v44, %v806_v57 }
 0x161   : > { %v2479_v53 = vpop.f32.mrf.mxu0 }
 0x162   : > { %v807_v56 = vmul.f32 %v2479_v53, %v3382_v38  ;;  %2520 = vmatprep.mubr.bf16.mxu1 %v870_v52  ;;  %v842_v62 = vadd.f32 %v3390_v44, %v804_v55 }
 0x163   : > { %v686_v58 = vpop.f32.mrf.mxu0  ;;  %2521 = vmatmul.mubr.bf16.vlgmr.msra.gmra.mxu1 %v871_v54 }
 0x164   : > { %v805_v59 = vmul.f32 %v3382_v38, %v686_v58  ;;  %v845_v60 = vadd.f32 %v3390_v44, %v807_v56 }
 0x165   : > { %v2482_v61 = vpop.f32.mrf.mxu0 }
 0x166   : > { %v843_v63 = vadd.f32 %v3390_v44, %v805_v59  ;;  %v873_v4 = vpack.c.bf16 %v845_v60, %v844_v0  ;;  %v810_v7 = vmul.f32 %v2482_v61, %v3382_v38 }
 0x167   : > { %v699_v1 = vpop.f32.mrf.mxu0 }
 0x168   : > { %v872_v2 = vpack.c.bf16 %v843_v63, %v842_v62  ;;  %v808_v5 = vmul.f32 %v3382_v38, %v699_v1  ;;  %v848_v14 = vadd.f32 %v3390_v44, %v810_v7 }
 0x169   : > { %v2483_v3 = vpop.f32.mrf.mxu0 }
 0x16a   : > { %v811_v6 = vmul.f32 %v2483_v3, %v3382_v38  ;;  %2524 = vmatprep.mubr.bf16.mxu1 %v872_v2  ;;  %v846_v12 = vadd.f32 %v3390_v44, %v808_v5 }
 0x16b   : > { %v702_v8 = vpop.f32.mrf.mxu0  ;;  %2525 = vmatmul.mubr.bf16.gmra.mxu1 %v873_v4 }
 0x16c   : > { %v809_v9 = vmul.f32 %v3382_v38, %v702_v8  ;;  %v849_v10 = vadd.f32 %v3390_v44, %v811_v6 }
 0x16d   : > { %v2486_v11 = vpop.f32.mrf.mxu0 }
 0x16e   : > { %v847_v13 = vadd.f32 %v3390_v44, %v809_v9  ;;  %v875_v18 = vpack.c.bf16 %v849_v10, %v848_v14  ;;  %v814_v21 = vmul.f32 %v2486_v11, %v3382_v38 }
 0x16f   : > { %v715_v15 = vpop.f32.mrf.mxu0 }
 0x170   : > { %v874_v16 = vpack.c.bf16 %v847_v13, %v846_v12  ;;  %v812_v19 = vmul.f32 %v3382_v38, %v715_v15  ;;  %v852_v28 = vadd.f32 %v3390_v44, %v814_v21 }
 0x171   : > { %v2487_v17 = vpop.f32.mrf.mxu0 }
 0x172   : > { %v815_v20 = vmul.f32 %v2487_v17, %v3382_v38  ;;  %2528 = vmatprep.mubr.bf16.mxu1 %v874_v16  ;;  %v850_v26 = vadd.f32 %v3390_v44, %v812_v19 }
 0x173   : > { %v718_v22 = vpop.f32.mrf.mxu0  ;;  %2529 = vmatmul.mubr.bf16.gmra.mxu1 %v875_v18 }
 0x174   : > { %v813_v23 = vmul.f32 %v3382_v38, %v718_v22  ;;  %v853_v24 = vadd.f32 %v3390_v44, %v815_v20 }
 0x175   : > { %v2490_v25 = vpop.f32.mrf.mxu0 }
 0x176   : > { %v851_v27 = vadd.f32 %v3390_v44, %v813_v23  ;;  %v877_v32 = vpack.c.bf16 %v853_v24, %v852_v28  ;;  %v818_v35 = vmul.f32 %v2490_v25, %v3382_v38  ;;  %v2775_v24 = vld [vmem:[#allocation8 + $0x18] sm:$0xff]   ;;  %v2776_v25 = vld [vmem:[#allocation8 + $0x10] sm:$0xff]  }
 0x177   : > { %v731_v29 = vpop.f32.mrf.mxu0  ;;  %2560 = vmatprep.subr.bf16.mxu0 %v2775_v24  ;;  %v2780_v28 = vld [vmem:[#allocation10 + $0x30] sm:$0xff]  }
 0x178   : > { %v876_v30 = vpack.c.bf16 %v851_v27, %v850_v26  ;;  %v816_v33 = vmul.f32 %v3382_v38, %v731_v29  ;;  %v856_v43 = vadd.f32 %v3390_v44, %v818_v35  ;;  %2561 = vmatpush3.bf16.msra.mxu0 %v2775_v24  ;;  %v2777_v26 = vld [vmem:[#allocation8 + $0x8] sm:$0xff]   ;;  %v2779_v27 = vld [vmem:[#allocation10 + $0x38] sm:$0xff]   ;;  %v2782_v29 = vld [vmem:[#allocation10 + $0x20] sm:$0xff]  }
 0x179   : > { %v2491_v31 = vpop.f32.mrf.mxu0  ;;  %2562 = vmatprep.subr.bf16.mxu0 %v2776_v25  ;;  %2600 = vmatprep.subr.bf16.mxu1 %v2779_v27 }
 0x17a   : > { %v819_v34 = vmul.f32 %v2491_v31, %v3382_v38  ;;  %2532 = vmatprep.mubr.bf16.mxu1 %v876_v30  ;;  %v854_v41 = vadd.f32 %v3390_v44, %v816_v33  ;;  %2601 = vmatpush3.bf16.msra.mxu1 %v2779_v27  ;;  %v3456_v30 = vld [vmem:[%s4067_s5] ss:$0 sm:$0xff] }
 0x17b   : > { %v734_v36 = vpop.f32.mrf.mxu0  ;;  %2533 = vmatmul.mubr.bf16.gmra.mxu1 %v877_v32  ;;  %2602 = vmatprep.subr.bf16.mxu1 %v2780_v28 }
 0x17c   : > { %v817_v37 = vmul.f32 %v3382_v38, %v734_v36  ;;  %v857_v39 = vadd.f32 %v3390_v44, %v819_v34  ;;  %2563 = vmatpush3.bf16.msra.mxu0 %v2776_v25 }
 0x17d   : > { %v2494_v40 = vpop.f32.mrf.mxu0  ;;  %2564 = vmatprep.subr.bf16.mxu0 %v2777_v26 }
 0x17e   : > { %v855_v42 = vadd.f32 %v3390_v44, %v817_v37  ;;  %v879_v48 = vpack.c.bf16 %v857_v39, %v856_v43  ;;  %v822_v51 = vmul.f32 %v2494_v40, %v3382_v38  ;;  %2603 = vmatpush3.bf16.msra.mxu1 %v2780_v28 }
 0x17f   : > { %v747_v45 = vpop.f32.mrf.mxu0 }
 0x180   : > { %v878_v46 = vpack.c.bf16 %v855_v42, %v854_v41  ;;  %v820_v49 = vmul.f32 %v3382_v38, %v747_v45  ;;  %v860_v58 = vadd.f32 %v3390_v44, %v822_v51  ;;  %2565 = vmatpush3.bf16.msra.mxu0 %v2777_v26 }
 0x181   : > { %v2495_v47 = vpop.f32.mrf.mxu0 }
 0x182   : > { %v823_v50 = vmul.f32 %v2495_v47, %v3382_v38  ;;  %2536 = vmatprep.mubr.bf16.mxu1 %v878_v46  ;;  %v858_v56 = vadd.f32 %v3390_v44, %v820_v49 }
 0x183   : > { %v750_v52 = vpop.f32.mrf.mxu0  ;;  %2537 = vmatmul.mubr.bf16.gmra.mxu1 %v879_v48 }
 0x184   : > { %v821_v53 = vmul.f32 %v3382_v38, %v750_v52  ;;  %v861_v54 = vadd.f32 %v3390_v44, %v823_v50 }
 0x185   : > { %v2498_v55 = vpop.f32.mrf.mxu0 }
 0x186   : > { %v859_v57 = vadd.f32 %v3390_v44, %v821_v53  ;;  %v881_v62 = vpack.c.bf16 %v861_v54, %v860_v58  ;;  %v826_v1 = vmul.f32 %v2498_v55, %v3382_v38 }
 0x187   : > { %v763_v59 = vpop.f32.mrf.mxu0 }
 0x188   : > { %v880_v60 = vpack.c.bf16 %v859_v57, %v858_v56  ;;  %v824_v63 = vmul.f32 %v3382_v38, %v763_v59  ;;  %v864_v8 = vadd.f32 %v3390_v44, %v826_v1 }
 0x189   : > { %v2499_v61 = vpop.f32.mrf.mxu0 }
 0x18a   : > { %v827_v0 = vmul.f32 %v2499_v61, %v3382_v38  ;;  %2540 = vmatprep.mubr.bf16.mxu1 %v880_v60  ;;  %v862_v6 = vadd.f32 %v3390_v44, %v824_v63 }
 0x18b   : > { %v766_v2 = vpop.f32.mrf.mxu0  ;;  %2541 = vmatmul.mubr.bf16.gmra.mxu1 %v881_v62 }
 0x18c   : > { %v825_v3 = vmul.f32 %v3382_v38, %v766_v2  ;;  %v865_v4 = vadd.f32 %v3390_v44, %v827_v0 }
 0x18d   : > { %v2502_v5 = vpop.f32.mrf.mxu0 }
 0x18e   : > { %v863_v7 = vadd.f32 %v3390_v44, %v825_v3  ;;  %v883_v12 = vpack.c.bf16 %v865_v4, %v864_v8  ;;  %v830_v15 = vmul.f32 %v2502_v5, %v3382_v38 }
 0x18f   : > { %v779_v9 = vpop.f32.mrf.mxu0 }
 0x190   : > { %v882_v10 = vpack.c.bf16 %v863_v7, %v862_v6  ;;  %v828_v13 = vmul.f32 %v3382_v38, %v779_v9  ;;  %v868_v21 = vadd.f32 %v3390_v44, %v830_v15 }
 0x191   : > { %v2503_v11 = vpop.f32.mrf.mxu0 }
 0x192   : > { %v831_v14 = vmul.f32 %v2503_v11, %v3382_v38  ;;  %2544 = vmatprep.mubr.bf16.mxu1 %v882_v10  ;;  %v866_v19 = vadd.f32 %v3390_v44, %v828_v13 }
 0x193   : > { %v782_v16 = vpop.f32.mrf.mxu0  ;;  %2545 = vmatmul.mubr.bf16.gmra.mxu1 %v883_v12 }
 0x194   : > { %v829_v17 = vmul.f32 %v3382_v38, %v782_v16  ;;  %v869_v18 = vadd.f32 %v3390_v44, %v831_v14  ;;  %v2778_v38 = vld [vmem:[#allocation8] sm:$0xff]  }
 0x195   : > { %2566 = vmatprep.subr.bf16.mxu0 %v2778_v38 }
 0x196   : > { %v867_v20 = vadd.f32 %v3390_v44, %v829_v17  ;;  %v885_v23 = vpack.c.bf16 %v869_v18, %v868_v21  ;;  %2567 = vmatpush3.bf16.msra.mxu0 %v2778_v38  ;;  %v2781_v44 = vld [vmem:[#allocation10 + $0x28] sm:$0xff]  }
 0x197   : > { %2604 = vmatprep.subr.bf16.mxu1 %v2781_v44 }
 0x198   : > { %v884_v22 = vpack.c.bf16 %v867_v20, %v866_v19  ;;  %2605 = vmatpush3.bf16.msra.mxu1 %v2781_v44 }
 0x199   : > { %2606 = vmatprep.subr.bf16.mxu1 %v2782_v29 }
 0x19a   : > { %2548 = vmatprep.mubr.bf16.mxu1 %v884_v22 }
 0x19b   : > { %2549 = vmatmul.mubr.bf16.gmra.mxu1 %v885_v23 }
 0x19c   : > { %2607 = vmatpush3.bf16.msra.mxu1 %v2782_v29 }
 0x223   : > { %v2522_v31 = vpop.f32.mrf.mxu1 }
 0x224   : > { %v3459_v32 = vadd.f32 %v2522_v31, %v3456_v30 }
 0x225   : > { %v991_v33 = vpop.f32.mrf.mxu1 }
 0x226   : > { %v1154_v34 = vmul.f32 1.442695, %v3459_v32  ;;  %v3463_v35 = vadd.f32 %v3456_v30, %v991_v33  ;;  %vm1120_vm0 = vcmp.gt.f32.partialorder %v3459_v32, 0.0 }
 0x227   : > { %v2523_v36 = vpop.f32.mrf.mxu1 }
 0x228   : > { %v1150_v37 = vmul.f32 1.442695, %v3463_v35  ;;  %v3467_v39 = vadd.f32 %v2523_v36, %v3456_v30  ;;  %2787 = vpow2.f32 %v1154_v34  ;;  %vm1118_vm1 = vcmp.gt.f32.partialorder %v3463_v35, 0.0 }
 0x229   : > { %v994_v40 = vpop.f32.mrf.mxu1 }
 0x22a   : > { %2789 = vpow2.f32 %v1150_v37  ;;  %v1156_v41 = vmul.f32 1.442695, %v3467_v39  ;;  %v3471_v42 = vadd.f32 %v3456_v30, %v994_v40  ;;  %vm1121_vm2 = vcmp.gt.f32.partialorder %v3467_v39, 0.0 }
 0x22b   : > { %v2526_v43 = vpop.f32.mrf.mxu1 }
 0x22c   : > { %2791 = vpow2.f32 %v1156_v41  ;;  %v1152_v45 = vmul.f32 1.442695, %v3471_v42  ;;  %v3475_v46 = vadd.f32 %v2526_v43, %v3456_v30  ;;  %vm1119_vm3 = vcmp.gt.f32.partialorder %v3471_v42, 0.0 }
 0x22d   : > { %v1007_v47 = vpop.f32.mrf.mxu1 }
 0x22e   : > { %2793 = vpow2.f32 %v1152_v45  ;;  %v3478_v48 = vadd.f32 %v3456_v30, %v1007_v47  ;;  %v1162_v49 = vmul.f32 1.442695, %v3475_v46  ;;  %vm1124_vm7 = vcmp.gt.f32.partialorder %v3475_v46, 0.0 }
 0x22f   : > { %v2527_v50 = vpop.f32.mrf.mxu1 }
 0x230   : > { %v1158_v51 = vmul.f32 1.442695, %v3478_v48  ;;  %v3483_v52 = vadd.f32 %v2527_v50, %v3456_v30  ;;  %vm1122_vm4 = vcmp.gt.f32.partialorder %v3478_v48, 0.0 }
 0x231   : > { %v1010_v53 = vpop.f32.mrf.mxu1 }
 0x232   : > { %2795 = vpow2.f32 %v1158_v51  ;;  %v1164_v54 = vmul.f32 1.442695, %v3483_v52  ;;  %v3487_v55 = vadd.f32 %v3456_v30, %v1010_v53  ;;  %vm1125_vm5 = vcmp.gt.f32.partialorder %v3483_v52, 0.0 }
 0x233   : > { %2797 = vpow2.f32 %v1162_v49  ;;  %v2530_v56 = vpop.f32.mrf.mxu1 }
 0x234   : > { %2799 = vpow2.f32 %v1164_v54  ;;  %v1160_v57 = vmul.f32 1.442695, %v3487_v55  ;;  %v3491_v58 = vadd.f32 %v2530_v56, %v3456_v30  ;;  %vm1123_vm6 = vcmp.gt.f32.partialorder %v3487_v55, 0.0 }
 0x235   : > { %v1023_v59 = vpop.f32.mrf.mxu1  ;;  %v2788_v60 = vpop.eup %2787 }
 0x236   : > { %2801 = vpow2.f32 %v1160_v57  ;;  %v1170_v61 = vmul.f32 1.442695, %v3491_v58  ;;  %v3495_v63 = vadd.f32 %v3456_v30, %v1023_v59  ;;  %v2273_v3 = vadd.f32 -1.0, %v2788_v60 }
 0x237   : > { %v2790_v62 = vpop.eup %2789  ;;  %v2531_v0 = vpop.f32.mrf.mxu1  ;;  %vm1128_vm8 = vcmp.gt.f32.partialorder %v3491_v58, 0.0 }
 0x238   : > { %v3498_v1 = vadd.f32 %v2531_v0, %v3456_v30  ;;  %v2271_v4 = vadd.f32 -1.0, %v2790_v62  ;;  %v1166_v5 = vmul.f32 1.442695, %v3495_v63  ;;  %2803 = vpow2.f32 %v1170_v61 }
 0x239   : > { %v2792_v2 = vpop.eup %2791  ;;  %v1026_v6 = vpop.f32.mrf.mxu1  ;;  %v1248_v15 = vmul.f32 1.6732632, %v2273_v3  ;;  %vm1126_vm9 = vcmp.gt.f32.partialorder %v3495_v63, 0.0 }
 0x23a   : > { %v2274_v7 = vadd.f32 -1.0, %v2792_v2  ;;  %v1172_v8 = vmul.f32 1.442695, %v3498_v1  ;;  %2805 = vpow2.f32 %v1166_v5  ;;  %v3503_v10 = vadd.f32 %v3456_v30, %v1026_v6 }
 0x23b   : > { %v2794_v9 = vpop.eup %2793  ;;  %v2534_v11 = vpop.f32.mrf.mxu1  ;;  %v1246_v18 = vmul.f32 1.6732632, %v2271_v4  ;;  %v1280_v28 = vsel %vm1120_vm0, %v3459_v32, %v1248_v15  ;;  %vm1129_vm10 = vcmp.gt.f32.partialorder %v3498_v1, 0.0 }
 0x23c   : > { %v1249_v12 = vmul.f32 1.6732632, %v2274_v7  ;;  %v2272_v13 = vadd.f32 -1.0, %v2794_v9  ;;  %2807 = vpow2.f32 %v1172_v8  ;;  %v3506_v14 = vadd.f32 %v2534_v11, %v3456_v30 }
 0x23d   : > { %v1168_v16 = vmul.f32 1.442695, %v3503_v10  ;;  %v1039_v17 = vpop.f32.mrf.mxu1  ;;  %v1278_v31 = vsel %vm1118_vm1, %v3463_v35, %v1246_v18  ;;  %vm1127_vm11 = vcmp.gt.f32.partialorder %v3503_v10, 0.0 }
 0x23e   : > { %v1178_v19 = vmul.f32 1.442695, %v3506_v14  ;;  %v3514_v21 = vadd.f32 %v3456_v30, %v1039_v17  ;;  %v1247_v23 = vmul.f32 1.6732632, %v2272_v13  ;;  %v1281_v25 = vsel %vm1121_vm2, %v3467_v39, %v1249_v12 }
 0x23f   : > { %v2796_v20 = vpop.eup %2795  ;;  %2809 = vpow2.f32 %v1168_v16  ;;  %v2535_v22 = vpop.f32.mrf.mxu1  ;;  %v1311_v40 = vpack.c.bf16 %v1281_v25, %v1280_v28  ;;  %vm1132_vm12 = vcmp.gt.f32.partialorder %v3506_v14, 0.0 }
 0x240   : > { %v2798_v24 = vpop.eup %2797  ;;  %v2275_v26 = vadd.f32 -1.0, %v2796_v20  ;;  %v3519_v38 = vadd.f32 %v2535_v22, %v3456_v30  ;;  %v1174_v44 = vmul.f32 1.442695, %v3514_v21  ;;  %v1279_v33 = vsel %vm1119_vm3, %v3471_v42, %v1247_v23 }
 0x241   : > { %v2800_v27 = vpop.eup %2799  ;;  %v1042_v29 = vpop.f32.mrf.mxu1  ;;  %2811 = vpow2.f32 %v1178_v19  ;;  %v2277_v41 = vadd.f32 -1.0, %v2798_v24  ;;  %v1310_v43 = vpack.c.bf16 %v1279_v33, %v1278_v31  ;;  %vm1130_vm13 = vcmp.gt.f32.partialorder %v3514_v21, 0.0 }
 0x242   : > { %v2278_v34 = vadd.f32 -1.0, %v2800_v27  ;;  %v1180_v36 = vmul.f32 1.442695, %v3519_v38  ;;  %v3529_v37 = vadd.f32 %v3456_v30, %v1042_v29  ;;  %2813 = vpow2.f32 %v1174_v44 }
 0x243   : > { %v2802_v39 = vpop.eup %2801  ;;  %v2538_v32 = vpop.f32.mrf.mxu1  ;;  %v1250_v35 = vmul.f32 1.6732632, %v2275_v26  ;;  %2568 = vmatprep.mubr.bf16.mxu0 %v1310_v43  ;;  %v1252_v59 = vmul.f32 1.6732632, %v2277_v41  ;;  %vm1133_vm14 = vcmp.gt.f32.partialorder %v3519_v38, 0.0 }
 0x244   : > { %v2276_v45 = vadd.f32 -1.0, %v2802_v39  ;;  %2815 = vpow2.f32 %v1180_v36  ;;  %v1176_v47 = vmul.f32 1.442695, %v3529_v37  ;;  %v3533_v42 = vadd.f32 %v2538_v32, %v3456_v30  ;;  %2569 = vmatmul.mubr.bf16.vlgmr.msra.gmra.mxu0 %v1311_v40 }
 0x245   : > { %v1055_v49 = vpop.f32.mrf.mxu1  ;;  %v1253_v50 = vmul.f32 1.6732632, %v2278_v34  ;;  %v2804_v54 = vpop.eup %2803  ;;  %v1282_v0 = vsel %vm1122_vm4, %v3478_v48, %v1250_v35  ;;  %vm1131_vm15 = vcmp.gt.f32.partialorder %v3529_v37, 0.0 }
 0x246   : > { %2817 = vpow2.f32 %v1176_v47  ;;  %v3537_v51 = vadd.f32 %v3456_v30, %v1055_v49  ;;  %v1251_v53 = vmul.f32 1.6732632, %v2276_v45  ;;  %v1186_v56 = vmul.f32 1.442695, %v3533_v42 }
 0x247   : > { %v2539_v57 = vpop.f32.mrf.mxu1  ;;  %v2806_v60 = vpop.eup %2805  ;;  %v1285_v7 = vsel %vm1125_vm5, %v3483_v52, %v1253_v50  ;;  %v2281_v11 = vadd.f32 -1.0, %v2804_v54  ;;  %vm1136_vm0 = vcmp.gt.f32.partialorder %v3533_v42, 0.0 }
 0x248   : > { %v1182_v61 = vmul.f32 1.442695, %v3537_v51  ;;  %v3544_v62 = vadd.f32 %v2539_v57, %v3456_v30  ;;  %v1283_v2 = vsel %vm1123_vm6, %v3487_v55, %v1251_v53  ;;  %v2279_v4 = vadd.f32 -1.0, %v2806_v60 }
 0x249   : > { %v2808_v3 = vpop.eup %2807  ;;  %v1058_v5 = vpop.f32.mrf.mxu1  ;;  %v1312_v6 = vpack.c.bf16 %v1283_v2, %v1282_v0  ;;  %v1284_v55 = vsel %vm1124_vm7, %v3475_v46, %v1252_v59  ;;  %v1256_v26 = vmul.f32 1.6732632, %v2281_v11  ;;  %vm1134_vm1 = vcmp.gt.f32.partialorder %v3537_v51, 0.0 }
 0x24a   : > { %v2282_v8 = vadd.f32 -1.0, %v2808_v3  ;;  %2819 = vpow2.f32 %v1182_v61  ;;  %v1188_v9 = vmul.f32 1.442695, %v3544_v62  ;;  %v3552_v12 = vadd.f32 %v3456_v30, %v1058_v5 }
 0x24b   : > { %2821 = vpow2.f32 %v1186_v56  ;;  %v2542_v48 = vpop.f32.mrf.mxu1  ;;  %2572 = vmatprep.mubr.bf16.mxu0 %v1312_v6  ;;  %v1313_v52 = vpack.c.bf16 %v1285_v7, %v1284_v55  ;;  %v1254_v16 = vmul.f32 1.6732632, %v2279_v4  ;;  %vm1137_vm2 = vcmp.gt.f32.partialorder %v3544_v62, 0.0 }
 0x24c   : > { %v2810_v13 = vpop.eup %2809  ;;  %2823 = vpow2.f32 %v1188_v9  ;;  %v3556_v15 = vadd.f32 %v2542_v48, %v3456_v30  ;;  %v1184_v18 = vmul.f32 1.442695, %v3552_v12  ;;  %v1257_v20 = vmul.f32 1.6732632, %v2282_v8 }
 0x24d   : > { %v2280_v17 = vadd.f32 -1.0, %v2810_v13  ;;  %v1071_v19 = vpop.f32.mrf.mxu1  ;;  %2573 = vmatmul.mubr.bf16.gmra.mxu0 %v1313_v52  ;;  %v1286_v34 = vsel %vm1126_vm9, %v3495_v63, %v1254_v16  ;;  %v1288_v63 = vsel %vm1128_vm8, %v3491_v58, %v1256_v26  ;;  %vm1135_vm3 = vcmp.gt.f32.partialorder %v3552_v12, 0.0 }
 0x24e   : > { %v3562_v22 = vadd.f32 %v3456_v30, %v1071_v19  ;;  %v2812_v46 = vpop.eup %2811  ;;  %2825 = vpow2.f32 %v1184_v18  ;;  %v1194_v23 = vmul.f32 1.442695, %v3556_v15  ;;  %v1289_v39 = vsel %vm1129_vm10, %v3498_v1, %v1257_v20 }
 0x24f   : > { %v2543_v24 = vpop.f32.mrf.mxu1  ;;  %v1255_v25 = vmul.f32 1.6732632, %v2280_v17  ;;  %v2814_v27 = vpop.eup %2813  ;;  %v2285_v40 = vadd.f32 -1.0, %v2812_v46  ;;  %vm1140_vm7 = vcmp.gt.f32.partialorder %v3556_v15, 0.0 }
 0x250   : > { %v1190_v28 = vmul.f32 1.442695, %v3562_v22  ;;  %v3569_v44 = vadd.f32 %v2543_v24, %v3456_v30  ;;  %v2283_v31 = vadd.f32 -1.0, %v2814_v27  ;;  %vm1138_vm4 = vcmp.gt.f32.partialorder %v3562_v22, 0.0 }
 0x251   : > { %v2816_v29 = vpop.eup %2815  ;;  %v1074_v33 = vpop.f32.mrf.mxu1  ;;  %v1287_v36 = vsel %vm1127_vm11, %v3503_v10, %v1255_v25  ;;  %v1315_v10 = vpack.c.bf16 %v1289_v39, %v1288_v63  ;;  %v1260_v0 = vmul.f32 1.6732632, %v2285_v40 }
 0x252   : > { %v2286_v41 = vadd.f32 -1.0, %v2816_v29  ;;  %2827 = vpow2.f32 %v1190_v28  ;;  %v1196_v32 = vmul.f32 1.442695, %v3569_v44  ;;  %v3578_v45 = vadd.f32 %v3456_v30, %v1074_v33 }
 0x253   : > { %v2818_v43 = vpop.eup %2817  ;;  %2829 = vpow2.f32 %v1194_v23  ;;  %v2546_v47 = vpop.f32.mrf.mxu1  ;;  %v1314_v35 = vpack.c.bf16 %v1287_v36, %v1286_v34  ;;  %v1258_v54 = vmul.f32 1.6732632, %v2283_v31  ;;  %v1292_v18 = vsel %vm1132_vm12, %v3506_v14, %v1260_v0 }
 0x254   : > { %v2284_v49 = vadd.f32 -1.0, %v2818_v43  ;;  %2831 = vpow2.f32 %v1196_v32  ;;  %v3584_v1 = vadd.f32 %v2546_v47, %v3456_v30  ;;  %v1192_v50 = vmul.f32 1.442695, %v3578_v45 }
 0x255   : > { %2576 = vmatprep.mubr.bf16.mxu0 %v1314_v35  ;;  %v1087_v53 = vpop.f32.mrf.mxu1  ;;  %v1261_v56 = vmul.f32 1.6732632, %v2286_v41  ;;  %v1290_v8 = vsel %vm1130_vm13, %v3514_v21, %v1258_v54  ;;  %vm1141_vm5 = vcmp.gt.f32.partialorder %v3569_v44, 0.0  ;;  %vm1139_vm6 = vcmp.gt.f32.partialorder %v3578_v45, 0.0 }
 0x256   : > { %2577 = vmatmul.mubr.bf16.gmra.mxu0 %v1315_v10  ;;  %v3589_v57 = vadd.f32 %v3456_v30, %v1087_v53  ;;  %v1259_v59 = vmul.f32 1.6732632, %v2284_v49  ;;  %2833 = vpow2.f32 %v1192_v50  ;;  %v1202_v60 = vmul.f32 1.442695, %v3584_v1 }
 0x257   : > { %v2820_v58 = vpop.eup %2819  ;;  %v2547_v61 = vpop.f32.mrf.mxu1  ;;  %v1293_v11 = vsel %vm1133_vm14, %v3519_v38, %v1261_v56  ;;  %vm1144_vm11 = vcmp.gt.f32.partialorder %v3584_v1, 0.0 }
 0x258   : > { %v2822_v2 = vpop.eup %2821  ;;  %v2287_v3 = vadd.f32 -1.0, %v2820_v58  ;;  %v1198_v4 = vmul.f32 1.442695, %v3589_v57  ;;  %v3597_v6 = vadd.f32 %v2547_v61, %v3456_v30  ;;  %v1291_v9 = vsel %vm1131_vm15, %v3529_v37, %v1259_v59 }
 0x259   : > { %v2824_v5 = vpop.eup %2823  ;;  %v1090_v7 = vpop.f32.mrf.mxu1  ;;  %v1316_v13 = vpack.c.bf16 %v1291_v9, %v1290_v8  ;;  %v2289_v52 = vadd.f32 -1.0, %v2822_v2  ;;  %v1317_v19 = vpack.c.bf16 %v1293_v11, %v1292_v18  ;;  %vm1142_vm8 = vcmp.gt.f32.partialorder %v3589_v57, 0.0 }
 0x25a   : > { %v2290_v48 = vadd.f32 -1.0, %v2824_v5  ;;  %2835 = vpow2.f32 %v1198_v4  ;;  %v3603_v55 = vadd.f32 %v3456_v30, %v1090_v7  ;;  %v1204_v16 = vmul.f32 1.442695, %v3597_v6 }
 0x25b   : > { %2837 = vpow2.f32 %v1202_v60  ;;  %v2550_v17 = vpop.f32.mrf.mxu1  ;;  %v2826_v21 = vpop.eup %2825  ;;  %2580 = vmatprep.mubr.bf16.mxu0 %v1316_v13  ;;  %v1262_v20 = vmul.f32 1.6732632, %v2287_v3  ;;  %v1264_v29 = vmul.f32 1.6732632, %v2289_v52  ;;  %vm1145_vm10 = vcmp.gt.f32.partialorder %v3597_v6, 0.0 }
 0x25c   : > { %v1200_v37 = vmul.f32 1.442695, %v3603_v55  ;;  %v3611_v38 = vadd.f32 %v2550_v17, %v3456_v30  ;;  %v2288_v46 = vadd.f32 -1.0, %v2826_v21  ;;  %2839 = vpow2.f32 %v1204_v16 }
 0x25d   : > { %v1103_v23 = vpop.f32.mrf.mxu1  ;;  %v1265_v24 = vmul.f32 1.6732632, %v2290_v48  ;;  %v1294_v34 = vsel %vm1134_vm1, %v3537_v51, %v1262_v20  ;;  %v1296_v51 = vsel %vm1136_vm0, %v3533_v42, %v1264_v29  ;;  %vm1143_vm9 = vcmp.gt.f32.partialorder %v3603_v55, 0.0 }
 0x25e   : > { %2841 = vpow2.f32 %v1200_v37  ;;  %v1210_v25 = vmul.f32 1.442695, %v3611_v38  ;;  %2581 = vmatmul.mubr.bf16.gmra.mxu0 %v1317_v19  ;;  %v3617_v26 = vadd.f32 %v3456_v30, %v1103_v23  ;;  %v1263_v28 = vmul.f32 1.6732632, %v2288_v46 }
 0x25f   : > { %v2828_v14 = vpop.eup %2827  ;;  %v2551_v27 = vpop.f32.mrf.mxu1  ;;  %v1297_v43 = vsel %vm1137_vm2, %v3544_v62, %v1265_v24  ;;  %vm1148_vm15 = vcmp.gt.f32.partialorder %v3611_v38, 0.0 }
 0x260   : > { %v2830_v31 = vpop.eup %2829  ;;  %v3622_v33 = vadd.f32 %v2551_v27, %v3456_v30  ;;  %v2291_v39 = vadd.f32 -1.0, %v2828_v14  ;;  %v1206_v40 = vmul.f32 1.442695, %v3617_v26  ;;  %v1295_v32 = vsel %vm1135_vm3, %v3552_v12, %v1263_v28 }
 0x261   : > { %v2832_v36 = vpop.eup %2831  ;;  %v1106_v41 = vpop.f32.mrf.mxu1  ;;  %2843 = vpow2.f32 %v1210_v25  ;;  %v2293_v49 = vadd.f32 -1.0, %v2830_v31  ;;  %v1318_v10 = vpack.c.bf16 %v1295_v32, %v1294_v34  ;;  %v1319_v53 = vpack.c.bf16 %v1297_v43, %v1296_v51 }
 0x262   : > { %v2294_v47 = vadd.f32 -1.0, %v2832_v36  ;;  %v1212_v35 = vmul.f32 1.442695, %v3622_v33  ;;  %v3630_v63 = vadd.f32 %v3456_v30, %v1106_v41  ;;  %2845 = vpow2.f32 %v1206_v40  ;;  %v2784_v40 = vld [vmem:[#allocation10 + $0x10] sm:$0xff]   ;;  %v2785_v41 = vld [vmem:[#allocation10 + $0x8] sm:$0xff]  }
 0x263   : > { %v2834_v50 = vpop.eup %2833  ;;  %2584 = vmatprep.mubr.bf16.mxu0 %v1318_v10  ;;  %v1266_v54 = vmul.f32 1.6732632, %v2291_v39  ;;  %v1268_v58 = vmul.f32 1.6732632, %v2293_v49  ;;  %vm1146_vm12 = vcmp.gt.f32.partialorder %v3617_v26, 0.0  ;;  %vm1149_vm14 = vcmp.gt.f32.partialorder %v3622_v33, 0.0 }
 0x264   : > { %2847 = vpow2.f32 %v1212_v35  ;;  %v1208_v12 = vmul.f32 1.442695, %v3630_v63  ;;  %v2292_v62 = vadd.f32 -1.0, %v2834_v50  ;;  %v1269_v56 = vmul.f32 1.6732632, %v2294_v47  ;;  %v2783_v39 = vld [vmem:[#allocation10 + $0x18] sm:$0xff]  }
 0x265   : > { %v1298_v61 = vsel %vm1138_vm4, %v3562_v22, %v1266_v54  ;;  %v1300_v9 = vsel %vm1140_vm7, %v3556_v15, %v1268_v58  ;;  %vm1147_vm13 = vcmp.gt.f32.partialorder %v3630_v63, 0.0  ;;  %2608 = vmatprep.subr.bf16.mxu1 %v2783_v39 }
 0x266   : > { %2849 = vpow2.f32 %v1208_v12  ;;  %2585 = vmatmul.mubr.bf16.gmra.mxu0 %v1319_v53  ;;  %v1267_v59 = vmul.f32 1.6732632, %v2292_v62  ;;  %v1301_v2 = vsel %vm1141_vm5, %v3569_v44, %v1269_v56  ;;  %2609 = vmatpush3.bf16.msra.mxu1 %v2783_v39 }
 0x267   : > { %v2836_v30 = vpop.eup %2835  ;;  %v1321_v48 = vpack.c.bf16 %v1301_v2, %v1300_v9  ;;  %2610 = vmatprep.subr.bf16.mxu1 %v2784_v40 }
 0x268   : > { %v2838_v60 = vpop.eup %2837  ;;  %v2295_v42 = vadd.f32 -1.0, %v2836_v30  ;;  %v1299_v0 = vsel %vm1139_vm6, %v3578_v45, %v1267_v59 }
 0x269   : > { %v2840_v3 = vpop.eup %2839  ;;  %v1320_v4 = vpack.c.bf16 %v1299_v0, %v1298_v61  ;;  %v2297_v7 = vadd.f32 -1.0, %v2838_v60 }
 0x26a   : > { %v2298_v8 = vadd.f32 -1.0, %v2840_v3  ;;  %v1270_v13 = vmul.f32 1.6732632, %v2295_v42  ;;  %2611 = vmatpush3.bf16.msra.mxu1 %v2784_v40 }
 0x26b   : > { %v2842_v5 = vpop.eup %2841  ;;  %2588 = vmatprep.mubr.bf16.mxu0 %v1320_v4  ;;  %v1272_v44 = vmul.f32 1.6732632, %v2297_v7  ;;  %2612 = vmatprep.subr.bf16.mxu1 %v2785_v41 }
 0x26c   : > { %v2296_v11 = vadd.f32 -1.0, %v2842_v5  ;;  %v1273_v52 = vmul.f32 1.6732632, %v2298_v8  ;;  %v1302_v17 = vsel %vm1142_vm8, %v3589_v57, %v1270_v13 }
 0x26d   : > { %v1304_v24 = vsel %vm1144_vm11, %v3584_v1, %v1272_v44 }
 0x26e   : > { %2589 = vmatmul.mubr.bf16.gmra.mxu0 %v1321_v48  ;;  %v1271_v22 = vmul.f32 1.6732632, %v2296_v11  ;;  %v2844_v16 = vpop.eup %2843  ;;  %v1305_v19 = vsel %vm1145_vm10, %v3597_v6, %v1273_v52  ;;  %2613 = vmatpush3.bf16.msra.mxu1 %v2785_v41 }
 0x26f   : > { %v2846_v45 = vpop.eup %2845  ;;  %v2301_v23 = vadd.f32 -1.0, %v2844_v16  ;;  %v1323_v14 = vpack.c.bf16 %v1305_v19, %v1304_v24 }
 0x270   : > { %v1303_v15 = vsel %vm1143_vm9, %v3603_v55, %v1271_v22  ;;  %v2299_v21 = vadd.f32 -1.0, %v2846_v45 }
 0x271   : > { %v2848_v18 = vpop.eup %2847  ;;  %v1322_v37 = vpack.c.bf16 %v1303_v15, %v1302_v17  ;;  %v1276_v55 = vmul.f32 1.6732632, %v2301_v23 }
 0x272   : > { %v2302_v20 = vadd.f32 -1.0, %v2848_v18  ;;  %v1274_v27 = vmul.f32 1.6732632, %v2299_v21 }
 0x273   : > { %v2850_v46 = vpop.eup %2849  ;;  %2592 = vmatprep.mubr.bf16.mxu0 %v1322_v37  ;;  %v1308_v34 = vsel %vm1148_vm15, %v3611_v38, %v1276_v55 }
 0x274   : > { %v2300_v25 = vadd.f32 -1.0, %v2850_v46  ;;  %v1277_v28 = vmul.f32 1.6732632, %v2302_v20  ;;  %v1306_v6 = vsel %vm1146_vm12, %v3617_v26, %v1274_v27  ;;  %v2786_v26 = vld [vmem:[#allocation10] sm:$0xff]  }
 0x275   : > { %2614 = vmatprep.subr.bf16.mxu1 %v2786_v26 }
 0x276   : > { %2593 = vmatmul.mubr.bf16.gmra.mxu0 %v1323_v14  ;;  %v1275_v57 = vmul.f32 1.6732632, %v2300_v25  ;;  %v1309_v1 = vsel %vm1149_vm14, %v3622_v33, %v1277_v28  ;;  %2615 = vmatpush3.bf16.msra.mxu1 %v2786_v26  ;;  %v3663_v33 = vld [vmem:[%s4069_s7] ss:$0 sm:$0xff] }
 0x277   : > { %v1325_v36 = vpack.c.bf16 %v1309_v1, %v1308_v34 }
 0x278   : > { %v1307_v29 = vsel %vm1147_vm13, %v3630_v63, %v1275_v57 }
 0x279   : > { %v1324_v31 = vpack.c.bf16 %v1307_v29, %v1306_v6 }
 0x27b   : > { %2596 = vmatprep.mubr.bf16.mxu0 %v1324_v31 }
 0x27e   : > { %2597 = vmatmul.mubr.bf16.gmra.mxu0 %v1325_v36 }
 0x304   : > { %v2570_v38 = vpop.f32.mrf.mxu0 }
 0x305   : > { %v3666_v32 = vadd.f32 %v2570_v38, %v3663_v33 }
 0x306   : > { %v1431_v43 = vpop.f32.mrf.mxu0 }
 0x307   : > { %v1594_v47 = vmul.f32 1.442695, %v3666_v32  ;;  %v3670_v35 = vadd.f32 %v3663_v33, %v1431_v43  ;;  %vm1560_vm0 = vcmp.gt.f32.partialorder %v3666_v32, 0.0 }
 0x308   : > { %v2571_v63 = vpop.f32.mrf.mxu0 }
 0x309   : > { %v1590_v49 = vmul.f32 1.442695, %v3670_v35  ;;  %v3674_v10 = vadd.f32 %v2571_v63, %v3663_v33  ;;  %2851 = vpow2.f32 %v1594_v47  ;;  %vm1558_vm1 = vcmp.gt.f32.partialorder %v3670_v35, 0.0 }
 0x30a   : > { %v1434_v51 = vpop.f32.mrf.mxu0 }
 0x30b   : > { %2853 = vpow2.f32 %v1590_v49  ;;  %v1596_v50 = vmul.f32 1.442695, %v3674_v10  ;;  %v3678_v12 = vadd.f32 %v3663_v33, %v1434_v51  ;;  %vm1561_vm2 = vcmp.gt.f32.partialorder %v3674_v10, 0.0 }
 0x30d   : > { %v2574_v53 = vpop.f32.mrf.mxu0  ;;  %2855 = vpow2.f32 %v1596_v50  ;;  %v1592_v62 = vmul.f32 1.442695, %v3678_v12  ;;  %vm1559_vm3 = vcmp.gt.f32.partialorder %v3678_v12, 0.0 }
 0x30e   : > { %v3682_v54 = vadd.f32 %v2574_v53, %v3663_v33 }
 0x30f   : > { %v1447_v56 = vpop.f32.mrf.mxu0  ;;  %2857 = vpow2.f32 %v1592_v62 }
 0x310   : > { %v3685_v30 = vadd.f32 %v3663_v33, %v1447_v56  ;;  %v1602_v59 = vmul.f32 1.442695, %v3682_v54  ;;  %vm1564_vm7 = vcmp.gt.f32.partialorder %v3682_v54, 0.0 }
 0x311   : > { %v2575_v58 = vpop.f32.mrf.mxu0 }
 0x312   : > { %v1598_v60 = vmul.f32 1.442695, %v3685_v30  ;;  %v3690_v42 = vadd.f32 %v2575_v58, %v3663_v33  ;;  %vm1562_vm4 = vcmp.gt.f32.partialorder %v3685_v30, 0.0 }
 0x313   : > { %v1450_v61 = vpop.f32.mrf.mxu0 }
 0x314   : > { %2859 = vpow2.f32 %v1598_v60  ;;  %v1604_v0 = vmul.f32 1.442695, %v3690_v42  ;;  %v3694_v2 = vadd.f32 %v3663_v33, %v1450_v61  ;;  %vm1565_vm5 = vcmp.gt.f32.partialorder %v3690_v42, 0.0 }
 0x315   : > { %2861 = vpow2.f32 %v1602_v59 }
 0x316   : > { %v2578_v3 = vpop.f32.mrf.mxu0  ;;  %2863 = vpow2.f32 %v1604_v0  ;;  %v1600_v4 = vmul.f32 1.442695, %v3694_v2  ;;  %v2852_v8 = vpop.eup %2851  ;;  %vm1563_vm6 = vcmp.gt.f32.partialorder %v3694_v2, 0.0 }
 0x317   : > { %v3698_v5 = vadd.f32 %v2578_v3, %v3663_v33  ;;  %v2314_v16 = vadd.f32 -1.0, %v2852_v8 }
 0x318   : > { %v1463_v7 = vpop.f32.mrf.mxu0  ;;  %2865 = vpow2.f32 %v1600_v4  ;;  %v2854_v11 = vpop.eup %2853 }
 0x319   : > { %v1610_v9 = vmul.f32 1.442695, %v3698_v5  ;;  %v3702_v48 = vadd.f32 %v3663_v33, %v1463_v7  ;;  %v2312_v44 = vadd.f32 -1.0, %v2854_v11  ;;  %v1688_v24 = vmul.f32 1.6732632, %v2314_v16 }
 0x31a   : > { %v2579_v13 = vpop.f32.mrf.mxu0  ;;  %v2856_v22 = vpop.eup %2855  ;;  %vm1568_vm8 = vcmp.gt.f32.partialorder %v3698_v5, 0.0 }
 0x31b   : > { %v3705_v52 = vadd.f32 %v2579_v13, %v3663_v33  ;;  %v1606_v45 = vmul.f32 1.442695, %v3702_v48  ;;  %v2315_v15 = vadd.f32 -1.0, %v2856_v22  ;;  %2867 = vpow2.f32 %v1610_v9 }
 0x31c   : > { %v1466_v17 = vpop.f32.mrf.mxu0  ;;  %v2858_v21 = vpop.eup %2857  ;;  %v1686_v27 = vmul.f32 1.6732632, %v2312_v44  ;;  %v1720_v40 = vsel %vm1560_vm0, %v3666_v32, %v1688_v24  ;;  %vm1566_vm9 = vcmp.gt.f32.partialorder %v3702_v48, 0.0 }
 0x31d   : > { %v1612_v18 = vmul.f32 1.442695, %v3705_v52  ;;  %2869 = vpow2.f32 %v1606_v45  ;;  %v3710_v37 = vadd.f32 %v3663_v33, %v1466_v17  ;;  %v1689_v20 = vmul.f32 1.6732632, %v2315_v15 }
 0x31e   : > { %v2582_v19 = vpop.f32.mrf.mxu0  ;;  %v2313_v46 = vadd.f32 -1.0, %v2858_v21  ;;  %v1718_v38 = vsel %vm1558_vm1, %v3670_v35, %v1686_v27  ;;  %vm1569_vm10 = vcmp.gt.f32.partialorder %v3705_v52, 0.0 }
 0x31f   : > { %2871 = vpow2.f32 %v1612_v18  ;;  %v3713_v23 = vadd.f32 %v2582_v19, %v3663_v33  ;;  %v1608_v25 = vmul.f32 1.442695, %v3710_v37  ;;  %v1721_v1 = vsel %vm1561_vm2, %v3674_v10, %v1689_v20 }
 0x320   : > { %v1479_v14 = vpop.f32.mrf.mxu0  ;;  %v1687_v29 = vmul.f32 1.6732632, %v2313_v46  ;;  %v1751_v51 = vpack.c.bf16 %v1721_v1, %v1720_v40  ;;  %vm1567_vm11 = vcmp.gt.f32.partialorder %v3710_v37, 0.0 }
 0x321   : > { %v1618_v28 = vmul.f32 1.442695, %v3713_v23  ;;  %v2860_v57 = vpop.eup %2859  ;;  %2873 = vpow2.f32 %v1608_v25  ;;  %v3721_v55 = vadd.f32 %v3663_v33, %v1479_v14  ;;  %vm1572_vm12 = vcmp.gt.f32.partialorder %v3713_v23, 0.0 }
 0x322   : > { %v2583_v6 = vpop.f32.mrf.mxu0  ;;  %v2862_v31 = vpop.eup %2861  ;;  %v2316_v34 = vadd.f32 -1.0, %v2860_v57  ;;  %v1719_v43 = vsel %vm1559_vm3, %v3678_v12, %v1687_v29 }
 0x323   : > { %v3726_v36 = vadd.f32 %v2583_v6, %v3663_v33  ;;  %v2864_v39 = vpop.eup %2863  ;;  %v1614_v41 = vmul.f32 1.442695, %v3721_v55  ;;  %2875 = vpow2.f32 %v1618_v28  ;;  %v2318_v50 = vadd.f32 -1.0, %v2862_v31 }
 0x324   : > { %v1482_v26 = vpop.f32.mrf.mxu0  ;;  %v2319_v47 = vadd.f32 -1.0, %v2864_v39  ;;  %v1750_v53 = vpack.c.bf16 %v1719_v43, %v1718_v38  ;;  %v1690_v35 = vmul.f32 1.6732632, %v2316_v34  ;;  %vm1570_vm13 = vcmp.gt.f32.partialorder %v3721_v55, 0.0 }
 0x325   : > { %v1620_v63 = vmul.f32 1.442695, %v3726_v36  ;;  %v3736_v49 = vadd.f32 %v3663_v33, %v1482_v26  ;;  %v2866_v10 = vpop.eup %2865  ;;  %2877 = vpow2.f32 %v1614_v41  ;;  %v1692_v7 = vmul.f32 1.6732632, %v2318_v50 }
 0x326   : > { %v2586_v32 = vpop.f32.mrf.mxu0  ;;  %v2317_v62 = vadd.f32 -1.0, %v2866_v10  ;;  %2616 = vmatprep.mubr.bf16.mxu1 %v1750_v53  ;;  %v1693_v58 = vmul.f32 1.6732632, %v2319_v47  ;;  %v1722_v13 = vsel %vm1562_vm4, %v3685_v30, %v1690_v35  ;;  %vm1573_vm14 = vcmp.gt.f32.partialorder %v3726_v36, 0.0 }
 0x327   : > { %2879 = vpow2.f32 %v1620_v63  ;;  %v1616_v56 = vmul.f32 1.442695, %v3736_v49  ;;  %v3740_v12 = vadd.f32 %v2586_v32, %v3663_v33  ;;  %2617 = vmatmul.mubr.bf16.vlgmr.msra.gmra.mxu1 %v1751_v51  ;;  %vm1571_vm15 = vcmp.gt.f32.partialorder %v3736_v49, 0.0 }
 0x328   : > { %v1495_v59 = vpop.f32.mrf.mxu0  ;;  %v1691_v61 = vmul.f32 1.6732632, %v2317_v62  ;;  %v2868_v0 = vpop.eup %2867  ;;  %v1725_v15 = vsel %vm1565_vm5, %v3690_v42, %v1693_v58 }
 0x329   : > { %2881 = vpow2.f32 %v1616_v56  ;;  %v3744_v60 = vadd.f32 %v3663_v33, %v1495_v59  ;;  %v1626_v3 = vmul.f32 1.442695, %v3740_v12  ;;  %v2322_v19 = vadd.f32 -1.0, %v2868_v0 }
 0x32a   : > { %v2587_v4 = vpop.f32.mrf.mxu0  ;;  %v2870_v8 = vpop.eup %2869  ;;  %v1723_v22 = vsel %vm1563_vm6, %v3694_v2, %v1691_v61  ;;  %v1724_v2 = vsel %vm1564_vm7, %v3682_v54, %v1692_v7  ;;  %vm1576_vm0 = vcmp.gt.f32.partialorder %v3740_v12, 0.0 }
 0x32b   : > { %v1622_v9 = vmul.f32 1.442695, %v3744_v60  ;;  %v3751_v11 = vadd.f32 %v2587_v4, %v3663_v33  ;;  %v2320_v44 = vadd.f32 -1.0, %v2870_v8  ;;  %v1752_v17 = vpack.c.bf16 %v1723_v22, %v1722_v13 }
 0x32c   : > { %v2872_v16 = vpop.eup %2871  ;;  %v1498_v45 = vpop.f32.mrf.mxu0  ;;  %v1753_v42 = vpack.c.bf16 %v1725_v15, %v1724_v2  ;;  %v1696_v34 = vmul.f32 1.6732632, %v2322_v19  ;;  %vm1574_vm1 = vcmp.gt.f32.partialorder %v3744_v60, 0.0 }
 0x32d   : > { %v2323_v18 = vadd.f32 -1.0, %v2872_v16  ;;  %2883 = vpow2.f32 %v1622_v9  ;;  %v1628_v21 = vmul.f32 1.442695, %v3751_v11  ;;  %v3759_v20 = vadd.f32 %v3663_v33, %v1498_v45  ;;  %2620 = vmatprep.mubr.bf16.mxu1 %v1752_v17 }
 0x32e   : > { %2885 = vpow2.f32 %v1626_v3  ;;  %v2590_v30 = vpop.f32.mrf.mxu0  ;;  %v2874_v46 = vpop.eup %2873  ;;  %v1694_v25 = vmul.f32 1.6732632, %v2320_v44  ;;  %vm1577_vm2 = vcmp.gt.f32.partialorder %v3751_v11, 0.0 }
 0x32f   : > { %2887 = vpow2.f32 %v1628_v21  ;;  %v3763_v24 = vadd.f32 %v2590_v30, %v3663_v33  ;;  %v2321_v14 = vadd.f32 -1.0, %v2874_v46  ;;  %v1624_v27 = vmul.f32 1.442695, %v3759_v20  ;;  %2621 = vmatmul.mubr.bf16.gmra.mxu1 %v1753_v42 }
 0x330   : > { %v1511_v28 = vpop.f32.mrf.mxu0  ;;  %v1697_v57 = vmul.f32 1.6732632, %v2323_v18  ;;  %v2876_v54 = vpop.eup %2875  ;;  %v1726_v47 = vsel %vm1566_vm9, %v3702_v48, %v1694_v25  ;;  %v1728_v48 = vsel %vm1568_vm8, %v3698_v5, %v1696_v34  ;;  %vm1575_vm3 = vcmp.gt.f32.partialorder %v3759_v20, 0.0 }
 0x331   : > { %v3769_v6 = vadd.f32 %v3663_v33, %v1511_v28  ;;  %2889 = vpow2.f32 %v1624_v27  ;;  %v1634_v29 = vmul.f32 1.442695, %v3763_v24  ;;  %v1695_v1 = vmul.f32 1.6732632, %v2321_v14 }
 0x332   : > { %v2591_v31 = vpop.f32.mrf.mxu0  ;;  %v2878_v39 = vpop.eup %2877  ;;  %v1729_v10 = vsel %vm1569_vm10, %v3705_v52, %v1697_v57  ;;  %v2326_v51 = vadd.f32 -1.0, %v2876_v54  ;;  %vm1580_vm7 = vcmp.gt.f32.partialorder %v3763_v24, 0.0 }
 0x333   : > { %v1630_v40 = vmul.f32 1.442695, %v3769_v6  ;;  %v3776_v41 = vadd.f32 %v2591_v31, %v3663_v33  ;;  %v2324_v38 = vadd.f32 -1.0, %v2878_v39  ;;  %v1727_v63 = vsel %vm1567_vm11, %v3710_v37, %v1695_v1 }
 0x334   : > { %v2880_v26 = vpop.eup %2879  ;;  %v1514_v43 = vpop.f32.mrf.mxu0  ;;  %v1754_v35 = vpack.c.bf16 %v1727_v63, %v1726_v47  ;;  %v1755_v37 = vpack.c.bf16 %v1729_v10, %v1728_v48  ;;  %v1700_v13 = vmul.f32 1.6732632, %v2326_v51  ;;  %vm1578_vm4 = vcmp.gt.f32.partialorder %v3769_v6, 0.0 }
 0x335   : > { %v2327_v50 = vadd.f32 -1.0, %v2880_v26  ;;  %2891 = vpow2.f32 %v1630_v40  ;;  %v1636_v32 = vmul.f32 1.442695, %v3776_v41  ;;  %v3785_v62 = vadd.f32 %v3663_v33, %v1514_v43 }
 0x336   : > { %v2882_v53 = vpop.eup %2881  ;;  %2893 = vpow2.f32 %v1634_v29  ;;  %v2594_v56 = vpop.f32.mrf.mxu0  ;;  %2624 = vmatprep.mubr.bf16.mxu1 %v1754_v35  ;;  %v1698_v0 = vmul.f32 1.6732632, %v2324_v38  ;;  %v1732_v27 = vsel %vm1572_vm12, %v3713_v23, %v1700_v13  ;;  %vm1581_vm5 = vcmp.gt.f32.partialorder %v3776_v41, 0.0 }
 0x337   : > { %v2325_v59 = vadd.f32 -1.0, %v2882_v53  ;;  %2895 = vpow2.f32 %v1636_v32  ;;  %v3791_v52 = vadd.f32 %v2594_v56, %v3663_v33  ;;  %v1632_v58 = vmul.f32 1.442695, %v3785_v62  ;;  %2625 = vmatmul.mubr.bf16.gmra.mxu1 %v1755_v37 }
 0x338   : > { %v1527_v61 = vpop.f32.mrf.mxu0  ;;  %v1701_v3 = vmul.f32 1.6732632, %v2327_v50  ;;  %v1730_v18 = vsel %vm1570_vm13, %v3721_v55, %v1698_v0  ;;  %vm1579_vm6 = vcmp.gt.f32.partialorder %v3785_v62, 0.0 }
 0x339   : > { %v3796_v4 = vadd.f32 %v3663_v33, %v1527_v61  ;;  %v1699_v7 = vmul.f32 1.6732632, %v2325_v59  ;;  %2897 = vpow2.f32 %v1632_v58  ;;  %v1642_v8 = vmul.f32 1.442695, %v3791_v52 }
 0x33a   : > { %v2884_v5 = vpop.eup %2883  ;;  %v2595_v9 = vpop.f32.mrf.mxu0  ;;  %v1733_v19 = vsel %vm1573_vm14, %v3726_v36, %v1701_v3  ;;  %vm1584_vm11 = vcmp.gt.f32.partialorder %v3791_v52, 0.0 }
 0x33b   : > { %v2886_v22 = vpop.eup %2885  ;;  %v2328_v16 = vadd.f32 -1.0, %v2884_v5  ;;  %v1638_v44 = vmul.f32 1.442695, %v3796_v4  ;;  %v3804_v17 = vadd.f32 %v2595_v9, %v3663_v33  ;;  %v1731_v21 = vsel %vm1571_vm15, %v3736_v49, %v1699_v7 }
 0x33c   : > { %v2888_v45 = vpop.eup %2887  ;;  %v1530_v15 = vpop.f32.mrf.mxu0  ;;  %v1756_v46 = vpack.c.bf16 %v1731_v21, %v1730_v18  ;;  %v2330_v42 = vadd.f32 -1.0, %v2886_v22  ;;  %v1757_v28 = vpack.c.bf16 %v1733_v19, %v1732_v27  ;;  %vm1582_vm8 = vcmp.gt.f32.partialorder %v3796_v4, 0.0 }
 0x33d   : > { %v2331_v30 = vadd.f32 -1.0, %v2888_v45  ;;  %2899 = vpow2.f32 %v1638_v44  ;;  %v3810_v2 = vadd.f32 %v3663_v33, %v1530_v15  ;;  %v1644_v25 = vmul.f32 1.442695, %v3804_v17 }
 0x33e   : > { %2901 = vpow2.f32 %v1642_v8  ;;  %v2598_v14 = vpop.f32.mrf.mxu0  ;;  %v2890_v55 = vpop.eup %2889  ;;  %2628 = vmatprep.mubr.bf16.mxu1 %v1756_v46  ;;  %v1702_v57 = vmul.f32 1.6732632, %v2328_v16  ;;  %v1704_v26 = vmul.f32 1.6732632, %v2330_v42  ;;  %vm1585_vm10 = vcmp.gt.f32.partialorder %v3804_v17, 0.0 }
 0x33f   : > { %v1640_v49 = vmul.f32 1.442695, %v3810_v2  ;;  %v3818_v36 = vadd.f32 %v2598_v14, %v3663_v33  ;;  %v2329_v54 = vadd.f32 -1.0, %v2890_v55  ;;  %2903 = vpow2.f32 %v1644_v25  ;;  %2629 = vmatmul.mubr.bf16.gmra.mxu1 %v1757_v28 }
 0x340   : > { %v1543_v29 = vpop.f32.mrf.mxu0  ;;  %v1705_v31 = vmul.f32 1.6732632, %v2331_v30  ;;  %v1734_v47 = vsel %vm1574_vm1, %v3744_v60, %v1702_v57  ;;  %v1736_v60 = vsel %vm1576_vm0, %v3740_v12, %v1704_v26  ;;  %vm1583_vm9 = vcmp.gt.f32.partialorder %v3810_v2, 0.0 }
 0x341   : > { %2905 = vpow2.f32 %v1640_v49  ;;  %v1650_v1 = vmul.f32 1.442695, %v3818_v36  ;;  %v3824_v34 = vadd.f32 %v3663_v33, %v1543_v29  ;;  %v1703_v40 = vmul.f32 1.6732632, %v2329_v54 }
 0x342   : > { %v2892_v23 = vpop.eup %2891  ;;  %v2599_v39 = vpop.f32.mrf.mxu0  ;;  %v1737_v53 = vsel %vm1577_vm2, %v3751_v11, %v1705_v31  ;;  %vm1588_vm15 = vcmp.gt.f32.partialorder %v3818_v36, 0.0 }
 0x343   : > { %v2894_v38 = vpop.eup %2893  ;;  %v3829_v43 = vadd.f32 %v2599_v39, %v3663_v33  ;;  %v2332_v10 = vadd.f32 -1.0, %v2892_v23  ;;  %v1646_v51 = vmul.f32 1.442695, %v3824_v34  ;;  %v1735_v32 = vsel %vm1575_vm3, %v3759_v20, %v1703_v40 }
 0x344   : > { %v2896_v63 = vpop.eup %2895  ;;  %v1546_v50 = vpop.f32.mrf.mxu0  ;;  %2907 = vpow2.f32 %v1650_v1  ;;  %v2334_v59 = vadd.f32 -1.0, %v2894_v38  ;;  %v1758_v37 = vpack.c.bf16 %v1735_v32, %v1734_v47  ;;  %v1759_v61 = vpack.c.bf16 %v1737_v53, %v1736_v60 }
 0x345   : > { %v2335_v56 = vadd.f32 -1.0, %v2896_v63  ;;  %v1652_v35 = vmul.f32 1.442695, %v3829_v43  ;;  %v3837_v48 = vadd.f32 %v3663_v33, %v1546_v50  ;;  %2909 = vpow2.f32 %v1646_v51 }
 0x346   : > { %v2898_v58 = vpop.eup %2897  ;;  %2632 = vmatprep.mubr.bf16.mxu1 %v1758_v37  ;;  %v1706_v0 = vmul.f32 1.6732632, %v2332_v10  ;;  %v1708_v5 = vmul.f32 1.6732632, %v2334_v59  ;;  %vm1586_vm12 = vcmp.gt.f32.partialorder %v3824_v34, 0.0  ;;  %vm1589_vm14 = vcmp.gt.f32.partialorder %v3829_v43, 0.0 }
 0x347   : > { %2911 = vpow2.f32 %v1652_v35  ;;  %v1648_v20 = vmul.f32 1.442695, %v3837_v48  ;;  %v2333_v11 = vadd.f32 -1.0, %v2898_v58  ;;  %v1709_v3 = vmul.f32 1.6732632, %v2335_v56  ;;  %2633 = vmatmul.mubr.bf16.gmra.mxu1 %v1759_v61 }
 0x348   : > { %v1738_v9 = vsel %vm1578_vm4, %v3769_v6, %v1706_v0  ;;  %v1740_v21 = vsel %vm1580_vm7, %v3763_v24, %v1708_v5  ;;  %vm1587_vm13 = vcmp.gt.f32.partialorder %v3837_v48, 0.0  ;;  %v3870_v10 = vld [vmem:[%s4071_s9] ss:$0 sm:$0xff] }
 0x349   : > { %2913 = vpow2.f32 %v1648_v20  ;;  %v1707_v7 = vmul.f32 1.6732632, %v2333_v11  ;;  %v1741_v22 = vsel %vm1581_vm5, %v3776_v41, %v1709_v3  ;;  %v3884_v56 = vld [vmem:[%s4064_s2] ss:$0 sm:$0xff] }
 0x34a   : > { %v2900_v33 = vpop.eup %2899  ;;  %v1761_v30 = vpack.c.bf16 %v1741_v22, %v1740_v21 }
 0x34b   : > { %v2902_v8 = vpop.eup %2901  ;;  %v2336_v12 = vadd.f32 -1.0, %v2900_v33  ;;  %v1739_v13 = vsel %vm1579_vm6, %v3785_v62, %v1707_v7 }
 0x34c   : > { %v2904_v16 = vpop.eup %2903  ;;  %v1760_v44 = vpack.c.bf16 %v1739_v13, %v1738_v9  ;;  %v2338_v15 = vadd.f32 -1.0, %v2902_v8 }
 0x34d   : > { %v2339_v18 = vadd.f32 -1.0, %v2904_v16  ;;  %v1710_v46 = vmul.f32 1.6732632, %v2336_v12 }
 0x34e   : > { %v2906_v45 = vpop.eup %2905  ;;  %2636 = vmatprep.mubr.bf16.mxu1 %v1760_v44  ;;  %v1712_v41 = vmul.f32 1.6732632, %v2338_v15 }
 0x34f   : > { %v2337_v19 = vadd.f32 -1.0, %v2906_v45  ;;  %v1713_v42 = vmul.f32 1.6732632, %v2339_v18  ;;  %2637 = vmatmul.mubr.bf16.gmra.mxu1 %v1761_v30  ;;  %v1742_v14 = vsel %vm1582_vm8, %v3796_v4, %v1710_v46 }
 0x350   : > { %v1744_v31 = vsel %vm1584_vm11, %v3791_v52, %v1712_v41 }
 0x351   : > { %v1711_v6 = vmul.f32 1.6732632, %v2337_v19  ;;  %v2908_v25 = vpop.eup %2907  ;;  %v1745_v28 = vsel %vm1585_vm10, %v3804_v17, %v1713_v42 }
 0x352   : > { %v2910_v62 = vpop.eup %2909  ;;  %v2342_v29 = vadd.f32 -1.0, %v2908_v25  ;;  %v1763_v23 = vpack.c.bf16 %v1745_v28, %v1744_v31 }
 0x353   : > { %v1743_v24 = vsel %vm1583_vm9, %v3810_v2, %v1711_v6  ;;  %v2340_v55 = vadd.f32 -1.0, %v2910_v62 }
 0x354   : > { %v2912_v27 = vpop.eup %2911  ;;  %v1762_v49 = vpack.c.bf16 %v1743_v24, %v1742_v14  ;;  %v1716_v17 = vmul.f32 1.6732632, %v2342_v29 }
 0x355   : > { %v2343_v57 = vadd.f32 -1.0, %v2912_v27  ;;  %v1714_v39 = vmul.f32 1.6732632, %v2340_v55 }
 0x356   : > { %v2914_v54 = vpop.eup %2913  ;;  %2640 = vmatprep.mubr.bf16.mxu1 %v1762_v49  ;;  %v1748_v47 = vsel %vm1588_vm15, %v3818_v36, %v1716_v17 }
 0x357   : > { %v2341_v1 = vadd.f32 -1.0, %v2914_v54  ;;  %v1717_v40 = vmul.f32 1.6732632, %v2343_v57  ;;  %2641 = vmatmul.mubr.bf16.gmra.mxu1 %v1763_v23  ;;  %v1746_v2 = vsel %vm1586_vm12, %v3824_v34, %v1714_v39 }
 0x359   : > { %v1715_v4 = vmul.f32 1.6732632, %v2341_v1  ;;  %v1749_v52 = vsel %vm1589_vm14, %v3829_v43, %v1717_v40  ;;  %v3877_v43 = vld [vmem:[%s4065_s3] ss:$0 sm:$0xff] }
 0x35a   : > { %v1765_v63 = vpack.c.bf16 %v1749_v52, %v1748_v47 }
 0x35b   : > { %v1747_v26 = vsel %vm1587_vm13, %v3837_v48, %v1715_v4 }
 0x35c   : > { %v1764_v38 = vpack.c.bf16 %v1747_v26, %v1746_v2 }
 0x35e   : > { %2644 = vmatprep.mubr.bf16.mxu1 %v1764_v38 }
 0x35f   : > { %2645 = vmatmul.mubr.bf16.gmra.mxu1 %v1765_v63 }
 0x3e7   : > { %v2618_v51 = vpop.f32.mrf.mxu1 }
 0x3e8   : > { %v1880_v34 = vadd.f32 %v2618_v51, %v3870_v10 }
 0x3e9   : > { %v1871_v50 = vpop.f32.mrf.mxu1 }
 0x3ea   : > { %v2000_v32 = vmul.f32 %v3877_v43, %v1880_v34  ;;  %v1872_v36 = vadd.f32 %v3870_v10, %v1871_v50 }
 0x3eb   : > { %v2619_v53 = vpop.f32.mrf.mxu1 }
 0x3ec   : > { %v2032_v35 = vadd.f32 %v3884_v56, %v2000_v32  ;;  %v1998_v48 = vmul.f32 %v3877_v43, %v1872_v36  ;;  %v1883_v59 = vadd.f32 %v2619_v53, %v3870_v10 }
 0x3ed   : > { %v1874_v37 = vpop.f32.mrf.mxu1 }
 0x3ee   : > { %2064 = vst [vmem:[%s3889_s19 + $0x10] sm:$0xff] %v2032_v35  ;;  %v2030_v60 = vadd.f32 %v3884_v56, %v1998_v48  ;;  %v2001_v58 = vmul.f32 %v3877_v43, %v1883_v59  ;;  %v1875_v20 = vadd.f32 %v3870_v10, %v1874_v37 }
 0x3ef   : > { %v2622_v61 = vpop.f32.mrf.mxu1 }
 0x3f0   : > { %2062 = vst [vmem:[%s3889_s19] sm:$0xff] %v2030_v60  ;;  %v2033_v11 = vadd.f32 %v3884_v56, %v2001_v58  ;;  %v1999_v0 = vmul.f32 %v3877_v43, %v1875_v20  ;;  %v1896_v3 = vadd.f32 %v2622_v61, %v3870_v10 }
 0x3f1   : > { %v1887_v33 = vpop.f32.mrf.mxu1 }
 0x3f2   : > { %2065 = vst [vmem:[%s3889_s19 + $0x18] sm:$0xff] %v2033_v11  ;;  %v2031_v7 = vadd.f32 %v3884_v56, %v1999_v0  ;;  %v2004_v5 = vmul.f32 %v3877_v43, %v1896_v3  ;;  %v1888_v8 = vadd.f32 %v3870_v10, %v1887_v33 }
 0x3f3   : > { %v2623_v12 = vpop.f32.mrf.mxu1 }
 0x3f4   : > { %2063 = vst [vmem:[%s3889_s19 + $0x8] sm:$0xff] %v2031_v7  ;;  %v2036_v9 = vadd.f32 %v3884_v56, %v2004_v5  ;;  %v2002_v13 = vmul.f32 %v3877_v43, %v1888_v8  ;;  %v1899_v22 = vadd.f32 %v2623_v12, %v3870_v10 }
 0x3f5   : > { %v1890_v16 = vpop.f32.mrf.mxu1 }
 0x3f6   : > { %2068 = vst [vmem:[%s3889_s19 + $0x30] sm:$0xff] %v2036_v9  ;;  %v2034_v44 = vadd.f32 %v3884_v56, %v2002_v13  ;;  %v2005_v45 = vmul.f32 %v3877_v43, %v1899_v22  ;;  %v1891_v15 = vadd.f32 %v3870_v10, %v1890_v16 }
 0x3f7   : > { %v2626_v18 = vpop.f32.mrf.mxu1 }
 0x3f8   : > { %2066 = vst [vmem:[%s3889_s19 + $0x20] sm:$0xff] %v2034_v44  ;;  %v2037_v21 = vadd.f32 %v3884_v56, %v2005_v45  ;;  %v2003_v19 = vmul.f32 %v3877_v43, %v1891_v15  ;;  %v1912_v30 = vadd.f32 %v2626_v18, %v3870_v10 }
 0x3f9   : > { %v1903_v46 = vpop.f32.mrf.mxu1 }
 0x3fa   : > { %2069 = vst [vmem:[%s3889_s19 + $0x38] sm:$0xff] %v2037_v21  ;;  %v2035_v42 = vadd.f32 %v3884_v56, %v2003_v19  ;;  %v2008_v6 = vmul.f32 %v3877_v43, %v1912_v30  ;;  %v1904_v25 = vadd.f32 %v3870_v10, %v1903_v46 }
 0x3fb   : > { %v2627_v41 = vpop.f32.mrf.mxu1 }
 0x3fc   : > { %2067 = vst [vmem:[%s3889_s19 + $0x28] sm:$0xff] %v2035_v42  ;;  %v2040_v62 = vadd.f32 %v3884_v56, %v2008_v6  ;;  %v2006_v14 = vmul.f32 %v3877_v43, %v1904_v25  ;;  %v1915_v24 = vadd.f32 %v2627_v41, %v3870_v10 }
 0x3fd   : > { %v1906_v27 = vpop.f32.mrf.mxu1 }
 0x3fe   : > { %2072 = vst [vmem:[%s3889_s19 + $0x50] sm:$0xff] %v2040_v62  ;;  %v2038_v55 = vadd.f32 %v3884_v56, %v2006_v14  ;;  %v2009_v49 = vmul.f32 %v3877_v43, %v1915_v24  ;;  %v1907_v28 = vadd.f32 %v3870_v10, %v1906_v27 }
 0x3ff   : > { %v2630_v57 = vpop.f32.mrf.mxu1 }
 0x400   : > { %2070 = vst [vmem:[%s3889_s19 + $0x40] sm:$0xff] %v2038_v55  ;;  %v2041_v54 = vadd.f32 %v3884_v56, %v2009_v49  ;;  %v2007_v29 = vmul.f32 %v3877_v43, %v1907_v28  ;;  %v1928_v31 = vadd.f32 %v2630_v57, %v3870_v10 }
 0x401   : > { %v1919_v1 = vpop.f32.mrf.mxu1 }
 0x402   : > { %2073 = vst [vmem:[%s3889_s19 + $0x58] sm:$0xff] %v2041_v54  ;;  %v2039_v23 = vadd.f32 %v3884_v56, %v2007_v29  ;;  %v2012_v39 = vmul.f32 %v3877_v43, %v1928_v31  ;;  %v1920_v40 = vadd.f32 %v3870_v10, %v1919_v1 }
 0x403   : > { %v2631_v4 = vpop.f32.mrf.mxu1 }
 0x404   : > { %2071 = vst [vmem:[%s3889_s19 + $0x48] sm:$0xff] %v2039_v23  ;;  %v2044_v17 = vadd.f32 %v3884_v56, %v2012_v39  ;;  %v2010_v2 = vmul.f32 %v3877_v43, %v1920_v40  ;;  %v1931_v26 = vadd.f32 %v2631_v4, %v3870_v10 }
 0x405   : > { %v1922_v38 = vpop.f32.mrf.mxu1 }
 0x406   : > { %2076 = vst [vmem:[%s3889_s19 + $0x70] sm:$0xff] %v2044_v17  ;;  %v2042_v52 = vadd.f32 %v3884_v56, %v2010_v2  ;;  %v2013_v47 = vmul.f32 %v3877_v43, %v1931_v26  ;;  %v1923_v63 = vadd.f32 %v3870_v10, %v1922_v38 }
 0x407   : > { %v2634_v51 = vpop.f32.mrf.mxu1 }
 0x408   : > { %2074 = vst [vmem:[%s3889_s19 + $0x60] sm:$0xff] %v2042_v52  ;;  %v2045_v34 = vadd.f32 %v3884_v56, %v2013_v47  ;;  %v2011_v50 = vmul.f32 %v3877_v43, %v1923_v63  ;;  %v1944_v32 = vadd.f32 %v2634_v51, %v3870_v10 }
 0x409   : > { %v1935_v36 = vpop.f32.mrf.mxu1 }
 0x40a   : > { %2077 = vst [vmem:[%s3889_s19 + $0x78] sm:$0xff] %v2045_v34  ;;  %v2043_v53 = vadd.f32 %v3884_v56, %v2011_v50  ;;  %v2016_v35 = vmul.f32 %v3877_v43, %v1944_v32  ;;  %v1936_v48 = vadd.f32 %v3870_v10, %v1935_v36 }
 0x40b   : > { %v2635_v59 = vpop.f32.mrf.mxu1 }
 0x40c   : > { %2075 = vst [vmem:[%s3889_s19 + $0x68] sm:$0xff] %v2043_v53  ;;  %v2048_v37 = vadd.f32 %v3884_v56, %v2016_v35  ;;  %v2014_v60 = vmul.f32 %v3877_v43, %v1936_v48  ;;  %v1947_v58 = vadd.f32 %v2635_v59, %v3870_v10 }
 0x40d   : > { %v1938_v20 = vpop.f32.mrf.mxu1 }
 0x40e   : > { %2080 = vst [vmem:[%s3889_s19 + $0x90] sm:$0xff] %v2048_v37  ;;  %v2046_v61 = vadd.f32 %v3884_v56, %v2014_v60  ;;  %v2017_v11 = vmul.f32 %v3877_v43, %v1947_v58  ;;  %v1939_v0 = vadd.f32 %v3870_v10, %v1938_v20 }
 0x40f   : > { %v2638_v3 = vpop.f32.mrf.mxu1 }
 0x410   : > { %2078 = vst [vmem:[%s3889_s19 + $0x80] sm:$0xff] %v2046_v61  ;;  %v2049_v33 = vadd.f32 %v3884_v56, %v2017_v11  ;;  %v2015_v7 = vmul.f32 %v3877_v43, %v1939_v0  ;;  %v1960_v5 = vadd.f32 %v2638_v3, %v3870_v10 }
 0x411   : > { %v1951_v8 = vpop.f32.mrf.mxu1 }
 0x412   : > { %2081 = vst [vmem:[%s3889_s19 + $0x98] sm:$0xff] %v2049_v33  ;;  %v2047_v12 = vadd.f32 %v3884_v56, %v2015_v7  ;;  %v2020_v9 = vmul.f32 %v3877_v43, %v1960_v5  ;;  %v1952_v13 = vadd.f32 %v3870_v10, %v1951_v8 }
 0x413   : > { %v2639_v22 = vpop.f32.mrf.mxu1 }
 0x414   : > { %2079 = vst [vmem:[%s3889_s19 + $0x88] sm:$0xff] %v2047_v12  ;;  %v2052_v16 = vadd.f32 %v3884_v56, %v2020_v9  ;;  %v2018_v44 = vmul.f32 %v3877_v43, %v1952_v13  ;;  %v1963_v45 = vadd.f32 %v2639_v22, %v3870_v10 }
 0x415   : > { %v1954_v15 = vpop.f32.mrf.mxu1 }
 0x416   : > { %2084 = vst [vmem:[%s3889_s19 + $0xb0] sm:$0xff] %v2052_v16  ;;  %v2050_v18 = vadd.f32 %v3884_v56, %v2018_v44  ;;  %v2021_v21 = vmul.f32 %v3877_v43, %v1963_v45  ;;  %v1955_v19 = vadd.f32 %v3870_v10, %v1954_v15 }
 0x417   : > { %v2642_v30 = vpop.f32.mrf.mxu1 }
 0x418   : > { %2082 = vst [vmem:[%s3889_s19 + $0xa0] sm:$0xff] %v2050_v18  ;;  %v2053_v46 = vadd.f32 %v3884_v56, %v2021_v21  ;;  %v2019_v42 = vmul.f32 %v3877_v43, %v1955_v19  ;;  %v1976_v6 = vadd.f32 %v2642_v30, %v3870_v10 }
 0x419   : > { %v1967_v25 = vpop.f32.mrf.mxu1 }
 0x41a   : > { %2085 = vst [vmem:[%s3889_s19 + $0xb8] sm:$0xff] %v2053_v46  ;;  %v2051_v41 = vadd.f32 %v3884_v56, %v2019_v42  ;;  %v2024_v62 = vmul.f32 %v3877_v43, %v1976_v6  ;;  %v1968_v14 = vadd.f32 %v3870_v10, %v1967_v25 }
 0x41b   : > { %v2643_v24 = vpop.f32.mrf.mxu1 }
 0x41c   : > { %2083 = vst [vmem:[%s3889_s19 + $0xa8] sm:$0xff] %v2051_v41  ;;  %v2056_v27 = vadd.f32 %v3884_v56, %v2024_v62  ;;  %v2022_v55 = vmul.f32 %v3877_v43, %v1968_v14  ;;  %v1979_v49 = vadd.f32 %v2643_v24, %v3870_v10 }
 0x41d   : > { %v1970_v28 = vpop.f32.mrf.mxu1 }
 0x41e   : > { %2088 = vst [vmem:[%s3889_s19 + $0xd0] sm:$0xff] %v2056_v27  ;;  %v2054_v57 = vadd.f32 %v3884_v56, %v2022_v55  ;;  %v2025_v54 = vmul.f32 %v3877_v43, %v1979_v49  ;;  %v1971_v29 = vadd.f32 %v3870_v10, %v1970_v28 }
 0x41f   : > { %v2646_v31 = vpop.f32.mrf.mxu1 }
 0x420   : > { %2086 = vst [vmem:[%s3889_s19 + $0xc0] sm:$0xff] %v2054_v57  ;;  %v2057_v1 = vadd.f32 %v3884_v56, %v2025_v54  ;;  %v2023_v23 = vmul.f32 %v3877_v43, %v1971_v29  ;;  %v1992_v39 = vadd.f32 %v2646_v31, %v3870_v10 }
 0x421   : > { %v1983_v40 = vpop.f32.mrf.mxu1 }
 0x422   : > { %2089 = vst [vmem:[%s3889_s19 + $0xd8] sm:$0xff] %v2057_v1  ;;  %v2055_v4 = vadd.f32 %v3884_v56, %v2023_v23  ;;  %v2028_v17 = vmul.f32 %v3877_v43, %v1992_v39  ;;  %v1984_v2 = vadd.f32 %v3870_v10, %v1983_v40 }
 0x423   : > { %v2647_v26 = vpop.f32.mrf.mxu1 }
 0x424   : > { %2087 = vst [vmem:[%s3889_s19 + $0xc8] sm:$0xff] %v2055_v4  ;;  %v2060_v38 = vadd.f32 %v3884_v56, %v2028_v17  ;;  %v2026_v52 = vmul.f32 %v3877_v43, %v1984_v2  ;;  %v1995_v47 = vadd.f32 %v2647_v26, %v3870_v10 }
 0x425   : > { %v1986_v63 = vpop.f32.mrf.mxu1 }
 0x426   : > { %2092 = vst [vmem:[%s3889_s19 + $0xf0] sm:$0xff] %v2060_v38  ;;  %v2058_v51 = vadd.f32 %v3884_v56, %v2026_v52  ;;  %v2029_v34 = vmul.f32 %v3877_v43, %v1995_v47  ;;  %v1987_v50 = vadd.f32 %v3870_v10, %v1986_v63 }
 0x428   : > { %2090 = vst [vmem:[%s3889_s19 + $0xe0] sm:$0xff] %v2058_v51  ;;  %v2061_v32 = vadd.f32 %v3884_v56, %v2029_v34  ;;  %v2027_v36 = vmul.f32 %v3877_v43, %v1987_v50 }
 0x42a   : > { %2093 = vst [vmem:[%s3889_s19 + $0xf8] sm:$0xff] %v2061_v32  ;;  %v2059_v10 = vadd.f32 %v3884_v56, %v2027_v36 }
 0x42c   : > { %2091 = vst [vmem:[%s3889_s19 + $0xe8] sm:$0xff] %v2059_v10 }
 0x42d   : > { %3062 = shalt.err (!%p3059_p3)
}
 0x42e   : > { %s3063_s8 = scalar_lea.hbm %s4015_s23, 4096  ;;  %s3067_s1 = scalar_lea.hbm %s4072_s10, 16384 }
 0x42f   : > { %p3064_p6 = scmp.ne.s32.totalorder %s4015_s23, %s3063_s8  ;;  %p3068_p9 = scmp.lt.s32.totalorder %s4015_s23, %s4072_s10 }
 0x430   : > { %p3069_p2 = scmp.lt.s32.totalorder %s3067_s1, %s3063_s8 }
 0x431   : > { %p3065_p4 = pnand %p3064_p6, %p4101_p11 }
 0x432   : > { %p3070_p0 = por %p3069_p2, %p3068_p9 }
 0x433   : > { %p3066_p8 = pneg %p3065_p4 }
 0x435   : > { %p3071_p5 = pnand %p3070_p0, %p3066_p8 }
 0x437   : > { %3074 = shalt.err (!%p3071_p5)
}
 0x438   : > { %s3131_s11 = smov 128   ;;  %s3132_s24 = smov 8  }
 0x439   : > { %2666 = dma.vmem_to_hbm [thread:$0]  (%p4101_p11), %s4017_s30, 4096, %s4015_s23, %s2095_s17, %s3131_s11, %s3131_s11, %s3132_s24  }
 0x43a PF: > { %p2698_p7 = scmp.ge.s32.totalorder %s3121_s16, 2  ;;  %s2123_s26 = sand.u32 1, %s3109_s13  }
 0x43b   : > { %p4102_p1 = scmp.ne.s32.totalorder %s4084_s20, 0  ;;  %s2124_s18 = scalar_lea.sflag [#allocation4], %s2123_s26 }
 0x43d   : > { %p2686_p12 = pnand %p2698_p7, %p4102_p1 }
 0x43f   : > { %p2687_p13 = pneg %p2686_p12 }
 0x441   : > { %3104 = dma.done.wait (%p2687_p13), %s2124_s18, 4096  }
 0x442   : > { %3106 = vsyncadd (%p2687_p13), %s2124_s18, 4294963200  ;;  %p25_p10 = scmp.ge.s32.totalorder %s3287_s27, 6   ;;  %s4103_s13 = smov %s3113_s14 }
 0x443   : > { %s4104_s14 = smov %s3117_s15  ;;  %s4105_s15 = smov %s3303_s12 }
 0x444   : > { %s4106_s16 = smov %s3287_s27  ;;  %27 = sbr.rel (!%p25_p10) target bundleno = 12 (0xc), region = 121 }
 0x449   :  { %2129 = vsyncpa [#allocation3], 1 }
 0x44a   :  { %2131 = vsyncpa [#allocation3 + $0x1], 1 }
 0x44b   :  { %2132 = vsyncpa [#allocation6], 1 }
 0x44c   :  { %2133 = vsyncpa [#allocation9], 1 }
 0x44d   :  { %2134 = vsyncpa [#allocation4], 1 }
 0x44e   :  { %2136 = vsyncpa [#allocation4 + $0x1], 1 }

</bundles_post_ra>
